<compile_context>
chip_gen: v7x
topology: tpu7x:2x2x1
jax: 0.10.0
libtpu: 0.0.40
codegen_flags: <defaults>
</compile_context>

<pallas_src>
import jax
import jax.numpy as jnp
from jax.experimental import pallas as pl
from jax.experimental.pallas import tpu as pltpu


def _mlp_kernel(x_ref, w0_ref, b0_ref, w1_ref, b1_ref, w2_ref, b2_ref, o_ref):
    # Fused forward (fc0 -> tanh -> 4x [fc1 -> tanh] -> fc2) for one batch tile,
    # feature-major: x [5, T], activations [64, T], output [2, T].
    x = x_ref[...]                      # [5, T] f32

    # Hoist all weight/bias Ref reads once (Mosaic does not reliably CSE Ref reads).
    w0 = w0_ref[...]                    # [64, 5]
    b0 = b0_ref[...]                    # [64, 1]
    w1 = w1_ref[...]                    # [64, 64]
    b1 = b1_ref[...]                    # [64, 1]
    w2 = w2_ref[...]                    # [2, 64]
    b2 = b2_ref[...]                    # [2, 1]

    u = jnp.tanh(jnp.dot(w0, x, preferred_element_type=jnp.float32) + b0)   # [64, T]

    # Pre-broadcast b1 to the activation tile ONCE; the unrolled loop would
    # otherwise emit 4 separate broadcast_in_dim ops.
    b1t = jnp.broadcast_to(b1, u.shape)

    # fc1 applied 4 times with *shared* weights (matches the PyTorch forward).
    for _ in range(4):
        u = jnp.tanh(jnp.dot(w1, u, preferred_element_type=jnp.float32) + b1t)

    out = jnp.dot(w2, u, preferred_element_type=jnp.float32) + b2           # [2, T]
    o_ref[...] = out.astype(o_ref.dtype)


def _round_up(v, m):
    return ((v + m - 1) // m) * m


def pinn_forward_t(x_t, params, *, tile_n=4096):
    """Feature-major forward. x_t: [5, N] float32 -> [2, N] float32."""
    w0, b0 = params["w0"], params["b0"]   # [64, 5],  [64, 1]
    w1, b1 = params["w1"], params["b1"]   # [64, 64], [64, 1]
    w2, b2 = params["w2"], params["b2"]   # [2, 64],  [2, 1]
    n = x_t.shape[1]

    # Batch (lane) tile: multiple of 128, or the full extent for tiny batches.
    if n <= 128:
        tile = n                                   # full-extent block (satisfies (8,128) rule)
    else:
        n_pad = _round_up(n, 128)
        tile = min(_round_up(tile_n, 128), n_pad)
        # v7x: keep >= 2 parallel grid steps so both TensorCores get work
        # (neutral on v5e/v6e which have a single TC).
        if pl.cdiv(n, tile) < 2:
            tile = _round_up(pl.cdiv(n_pad, 2), 128)

    grid = (pl.cdiv(n, tile),)

    # Weights/biases: one block == full array, same block index every grid step
    # -> they stay resident in VMEM across the whole grid.
    def pinned(arr):
        return pl.BlockSpec(arr.shape, lambda i: (0, 0))

    weight_bytes = 4 * (64 * 5 + 64 + 64 * 64 + 64 + 2 * 64 + 2)
    cost = pl.CostEstimate(
        flops=2 * n * (5 * 64 + 4 * 64 * 64 + 64 * 2),
        transcendentals=5 * 64 * n,                 # 5 tanh layers of width 64 per column
        bytes_accessed=n * (5 + 2) * 4 + weight_bytes,
    )

    return pl.pallas_call(
        _mlp_kernel,
        out_shape=jax.ShapeDtypeStruct((2, n), jnp.float32),
        grid_spec=pltpu.PrefetchScalarGridSpec(
            num_scalar_prefetch=0,
            grid=grid,
            in_specs=[
                pl.BlockSpec((5, tile), lambda i: (0, i)),   # batch-tiled, lane-major input
                pinned(w0), pinned(b0),
                pinned(w1), pinned(b1),
                pinned(w2), pinned(b2),
            ],
            out_specs=pl.BlockSpec((2, tile), lambda i: (0, i)),  # lane-dense output
        ),
        compiler_params=pltpu.CompilerParams(
            # Independent batch tiles -> parallel (v7x megacore sharding).
            dimension_semantics=("parallel",),
        ),
        cost_estimate=cost,
    )(x_t, w0, b0, w1, b1, w2, b2)


def pinn_forward(x, params, *, tile_n=4096):
    """PyTorch-module-compatible wrapper: x [N, 5] float32 -> [N, 2] float32.

    The layout transposes happen once outside the kernel; callers that can hold
    collocation points feature-major should call pinn_forward_t directly.
    """
    return pinn_forward_t(x.T, params, tile_n=tile_n).T


def init_params(key):
    """PyTorch nn.Linear-style init (U[-1/sqrt(in), 1/sqrt(in)]), native [out, in] layout."""
    ks = jax.random.split(key, 6)

    def lin(kw, kb, fan_in, fan_out):
        bound = 1.0 / jnp.sqrt(fan_in)
        w = jax.random.uniform(kw, (fan_out, fan_in), jnp.float32, -bound, bound)
        b = jax.random.uniform(kb, (fan_out, 1), jnp.float32, -bound, bound)
        return w, b

    w0, b0 = lin(ks[0], ks[1], 5, 64)
    w1, b1 = lin(ks[2], ks[3], 64, 64)
    w2, b2 = lin(ks[4], ks[5], 64, 2)
    return {"w0": w0, "b0": b0, "w1": w1, "b1": b1, "w2": w2, "b2": b2}


def _reference(x, p):
    """Pure-JAX reference with PyTorch semantics: x [N, 5] -> [N, 2]."""
    u = jnp.tanh(x @ p["w0"].T + p["b0"].T)
    for _ in range(4):
        u = jnp.tanh(u @ p["w1"].T + p["b1"].T)
    return u @ p["w2"].T + p["b2"].T


if __name__ == "__main__":
    key = jax.random.PRNGKey(0)
    kx, kp = jax.random.split(key)

    # Multi-tile batch: 2048 columns -> tile is split to 1024 -> 2 parallel grid steps.
    batch = 2048
    x = jax.random.normal(kx, (batch, 5), dtype=jnp.float32)
    params = init_params(kp)

    out = jax.block_until_ready(pinn_forward(x, params))
    ref = _reference(x, params)
    assert out.shape == (batch, 2)
    assert jnp.allclose(out, ref, atol=1e-4, rtol=1e-4), "mismatch vs. pure-JAX reference"

    # Tiny / non-multiple-of-tile path (single full-extent block).
    x_small = jax.random.normal(kx, (10, 5), dtype=jnp.float32)
    out_small = jax.block_until_ready(pinn_forward(x_small, params))
    assert out_small.shape == (10, 2)
    assert jnp.allclose(out_small, _reference(x_small, params), atol=1e-4, rtol=1e-4)

    print("KERNEL_OK")
</pallas_src>

<mosaic_0001>
module attributes {stable_mosaic.version = 11 : i64} {
  func.func @_mlp_kernel(%arg0: i32, %arg1: memref<5x1024xf32, #tpu.memory_space<vmem>>, %arg2: memref<64x5xf32, #tpu.memory_space<vmem>>, %arg3: memref<64x1xf32, #tpu.memory_space<vmem>>, %arg4: memref<64x64xf32, #tpu.memory_space<vmem>>, %arg5: memref<64x1xf32, #tpu.memory_space<vmem>>, %arg6: memref<2x64xf32, #tpu.memory_space<vmem>>, %arg7: memref<2x1xf32, #tpu.memory_space<vmem>>, %arg8: memref<2x1024xf32, #tpu.memory_space<vmem>>) attributes {dimension_semantics = [#tpu.dimension_semantics<parallel>], iteration_bounds = array<i64: 2>, scalar_prefetch = 0 : i64, scratch_operands = 0 : i64, tpu.core_type = #tpu.core_type<tc>, window_params = [{transform_indices = @transform_0, window_bounds = array<i64: 5, 1024>}, {pipeline_mode = #tpu.pipeline_mode<synchronous>, transform_indices = @transform_1, window_bounds = array<i64: 64, 5>}, {pipeline_mode = #tpu.pipeline_mode<synchronous>, transform_indices = @transform_2, window_bounds = array<i64: 64, 1>}, {pipeline_mode = #tpu.pipeline_mode<synchronous>, transform_indices = @transform_3, window_bounds = array<i64: 64, 64>}, {pipeline_mode = #tpu.pipeline_mode<synchronous>, transform_indices = @transform_4, window_bounds = array<i64: 64, 1>}, {pipeline_mode = #tpu.pipeline_mode<synchronous>, transform_indices = @transform_5, window_bounds = array<i64: 2, 64>}, {pipeline_mode = #tpu.pipeline_mode<synchronous>, transform_indices = @transform_6, window_bounds = array<i64: 2, 1>}, {transform_indices = @transform_7, window_bounds = array<i64: 2, 1024>}]} {
    %c0 = arith.constant 0 : index
    %c0_0 = arith.constant 0 : index
    %0 = vector.load %arg1[%c0, %c0_0] : memref<5x1024xf32, #tpu.memory_space<vmem>>, vector<5x1024xf32>
    %c0_1 = arith.constant 0 : index
    %c0_2 = arith.constant 0 : index
    %1 = vector.load %arg2[%c0_1, %c0_2] : memref<64x5xf32, #tpu.memory_space<vmem>>, vector<64x5xf32>
    %c0_3 = arith.constant 0 : index
    %c0_4 = arith.constant 0 : index
    %2 = vector.load %arg3[%c0_3, %c0_4] : memref<64x1xf32, #tpu.memory_space<vmem>>, vector<64x1xf32>
    %c0_5 = arith.constant 0 : index
    %c0_6 = arith.constant 0 : index
    %3 = vector.load %arg4[%c0_5, %c0_6] : memref<64x64xf32, #tpu.memory_space<vmem>>, vector<64x64xf32>
    %c0_7 = arith.constant 0 : index
    %c0_8 = arith.constant 0 : index
    %4 = vector.load %arg5[%c0_7, %c0_8] : memref<64x1xf32, #tpu.memory_space<vmem>>, vector<64x1xf32>
    %c0_9 = arith.constant 0 : index
    %c0_10 = arith.constant 0 : index
    %5 = vector.load %arg6[%c0_9, %c0_10] : memref<2x64xf32, #tpu.memory_space<vmem>>, vector<2x64xf32>
    %c0_11 = arith.constant 0 : index
    %c0_12 = arith.constant 0 : index
    %6 = vector.load %arg7[%c0_11, %c0_12] : memref<2x1xf32, #tpu.memory_space<vmem>>, vector<2x1xf32>
    %cst = arith.constant dense<0.000000e+00> : vector<64x1024xf32>
    %7 = tpu.matmul %1, %0, %cst {dimension_numbers = #tpu.dot_dimension_numbers<[1], [0], [0], [1], [0, 0, 1, 1], [], []>} : vector<64x5xf32>, vector<5x1024xf32>, vector<64x1024xf32> -> vector<64x1024xf32>
    %8 = vector.broadcast %2 : vector<64x1xf32> to vector<64x1024xf32>
    %9 = arith.addf %7, %8 : vector<64x1024xf32>
    %10 = math.tanh %9 : vector<64x1024xf32>
    %11 = vector.shape_cast %4 : vector<64x1xf32> to vector<64x1xf32>
    %12 = vector.broadcast %11 : vector<64x1xf32> to vector<64x1024xf32>
    %cst_13 = arith.constant dense<0.000000e+00> : vector<64x1024xf32>
    %13 = tpu.matmul %3, %10, %cst_13 {dimension_numbers = #tpu.dot_dimension_numbers<[1], [0], [0], [1], [0, 0, 1, 1], [], []>} : vector<64x64xf32>, vector<64x1024xf32>, vector<64x1024xf32> -> vector<64x1024xf32>
    %14 = arith.addf %13, %12 : vector<64x1024xf32>
    %15 = math.tanh %14 : vector<64x1024xf32>
    %cst_14 = arith.constant dense<0.000000e+00> : vector<64x1024xf32>
    %16 = tpu.matmul %3, %15, %cst_14 {dimension_numbers = #tpu.dot_dimension_numbers<[1], [0], [0], [1], [0, 0, 1, 1], [], []>} : vector<64x64xf32>, vector<64x1024xf32>, vector<64x1024xf32> -> vector<64x1024xf32>
    %17 = arith.addf %16, %12 : vector<64x1024xf32>
    %18 = math.tanh %17 : vector<64x1024xf32>
    %cst_15 = arith.constant dense<0.000000e+00> : vector<64x1024xf32>
    %19 = tpu.matmul %3, %18, %cst_15 {dimension_numbers = #tpu.dot_dimension_numbers<[1], [0], [0], [1], [0, 0, 1, 1], [], []>} : vector<64x64xf32>, vector<64x1024xf32>, vector<64x1024xf32> -> vector<64x1024xf32>
    %20 = arith.addf %19, %12 : vector<64x1024xf32>
    %21 = math.tanh %20 : vector<64x1024xf32>
    %cst_16 = arith.constant dense<0.000000e+00> : vector<64x1024xf32>
    %22 = tpu.matmul %3, %21, %cst_16 {dimension_numbers = #tpu.dot_dimension_numbers<[1], [0], [0], [1], [0, 0, 1, 1], [], []>} : vector<64x64xf32>, vector<64x1024xf32>, vector<64x1024xf32> -> vector<64x1024xf32>
    %23 = arith.addf %22, %12 : vector<64x1024xf32>
    %24 = math.tanh %23 : vector<64x1024xf32>
    %cst_17 = arith.constant dense<0.000000e+00> : vector<2x1024xf32>
    %25 = tpu.matmul %5, %24, %cst_17 {dimension_numbers = #tpu.dot_dimension_numbers<[1], [0], [0], [1], [0, 0, 1, 1], [], []>} : vector<2x64xf32>, vector<64x1024xf32>, vector<2x1024xf32> -> vector<2x1024xf32>
    %26 = vector.broadcast %6 : vector<2x1xf32> to vector<2x1024xf32>
    %27 = arith.addf %25, %26 : vector<2x1024xf32>
    %c0_18 = arith.constant 0 : index
    %c0_19 = arith.constant 0 : index
    %28 = vector.load %arg8[%c0_18, %c0_19] : memref<2x1024xf32, #tpu.memory_space<vmem>>, vector<2x1024xf32>
    tpu.vector_store %arg8[%c0_18, %c0_19], %27 {strides = array<i32>} : memref<2x1024xf32, #tpu.memory_space<vmem>>, vector<2x1024xf32>,
    return
  }
  func.func @transform_0(%arg0: i32) -> (i32, i32) {
    %c0_i32 = arith.constant 0 : i32
    %c0_i32_0 = arith.constant 0 : i32
    return %c0_i32, %arg0 : i32, i32
  }
  func.func @transform_1(%arg0: i32) -> (i32, i32) {
    %c0_i32 = arith.constant 0 : i32
    %c0_i32_0 = arith.constant 0 : i32
    %c0_i32_1 = arith.constant 0 : i32
    return %c0_i32, %c0_i32_0 : i32, i32
  }
  func.func @transform_2(%arg0: i32) -> (i32, i32) {
    %c0_i32 = arith.constant 0 : i32
    %c0_i32_0 = arith.constant 0 : i32
    %c0_i32_1 = arith.constant 0 : i32
    return %c0_i32, %c0_i32_0 : i32, i32
  }
  func.func @transform_3(%arg0: i32) -> (i32, i32) {
    %c0_i32 = arith.constant 0 : i32
    %c0_i32_0 = arith.constant 0 : i32
    %c0_i32_1 = arith.constant 0 : i32
    return %c0_i32, %c0_i32_0 : i32, i32
  }
  func.func @transform_4(%arg0: i32) -> (i32, i32) {
    %c0_i32 = arith.constant 0 : i32
    %c0_i32_0 = arith.constant 0 : i32
    %c0_i32_1 = arith.constant 0 : i32
    return %c0_i32, %c0_i32_0 : i32, i32
  }
  func.func @transform_5(%arg0: i32) -> (i32, i32) {
    %c0_i32 = arith.constant 0 : i32
    %c0_i32_0 = arith.constant 0 : i32
    %c0_i32_1 = arith.constant 0 : i32
    return %c0_i32, %c0_i32_0 : i32, i32
  }
  func.func @transform_6(%arg0: i32) -> (i32, i32) {
    %c0_i32 = arith.constant 0 : i32
    %c0_i32_0 = arith.constant 0 : i32
    %c0_i32_1 = arith.constant 0 : i32
    return %c0_i32, %c0_i32_0 : i32, i32
  }
  func.func @transform_7(%arg0: i32) -> (i32, i32) {
    %c0_i32 = arith.constant 0 : i32
    %c0_i32_0 = arith.constant 0 : i32
    return %c0_i32, %arg0 : i32, i32
  }
}

</mosaic_0001>

<bundles_post_ra>
// kernel: tpu_custom_call.1
= control target key start
LH: loop header
LB: loop body
LE: loop exit
PB: predicated region body
PF: predicated region fallthrough
CT: control target
= control target key end

     0   :  { %12 = vsyncpa [#allocation3], 0  ;;  %s5907_s0 = inlined_call_operand.vmem [shape: f32[5,2048], index: 0, kind: input, shape index: {}]   ;;  %s5908_s1 = inlined_call_operand.vmem [shape: f32[64,5], index: 1, kind: input, shape index: {}]   ;;  %s5909_s2 = inlined_call_operand.vmem [shape: f32[64,1], index: 2, kind: input, shape index: {}]   ;;  %s5910_s3 = inlined_call_operand.vmem [shape: f32[64,64], index: 3, kind: input, shape index: {}]   ;;  %s5911_s4 = inlined_call_operand.vmem [shape: f32[64,1], index: 4, kind: input, shape index: {}]   ;;  %s5912_s5 = inlined_call_operand.vmem [shape: f32[2,64], index: 5, kind: input, shape index: {}]   ;;  %s5913_s6 = inlined_call_operand.vmem [shape: f32[2,1], index: 6, kind: input, shape index: {}]   ;;  %s5914_s7 = inlined_call_operand.hbm [shape: f32[2,2048], index: 7, kind: output, shape index: {}]  }
   0x1   :  { %14 = vsyncpa [#allocation3 + $0x1], 0  ;;  %s4776_s24 = smov 0   ;;  %s4778_s25 = smov 0  }
   0x2   :  { %s4780_s26 = smov 0   ;;  %s4782_s27 = smov 0  }
   0x3 LB: > { %s4797_s28 = sadd.s32 4294967295, %s4730_s27   ;;  %s3469_s29 = sadd.s32 4294967294, %s4730_s27   ;;  %s4730_s27 = sphi %s4782_s27, %s5920_s27   ;;  %s4726_s26 = sphi %s4780_s26, %s5919_s26   ;;  %s4722_s25 = sphi %s4778_s25, %s5918_s25   ;;  %s4718_s24 = sphi %s4776_s24, %s5917_s24  }
   0x4   : > { %s4801_s30 = sadd.s32 1, %s4730_s27   ;;  %s179_s8 = sadd.s32 1, %s4726_s26 }
   0x5   : > { %s176_s9 = ssub.s32 %s4730_s27, %s4801_s30  ;;  %p189_p0 = scmp.ne.s32.totalorder %s4726_s26, %s4722_s25 }
   0x6   : > { %p177_p1 = scmp.eq.s32.totalorder %s176_s9, 0  ;;  %p190_p2 = scmp.eq.s32.totalorder %s4797_s28, 1 }
   0x7   : > { %p195_p3 = scmp.ne.s32.totalorder %s4722_s25, %s4718_s24  ;;  %p196_p4 = scmp.eq.s32.totalorder %s3469_s29, 1 }
   0x8   : > { %s4812_s10 = scalar_select %p177_p1, %s4726_s26, %s179_s8  }
   0x9   : > { %p4814_p5 = por %p190_p2, %p189_p0  ;;  %p4818_p6 = por %p196_p4, %p195_p3 }
   0xa   : > { %p3472_p7 = scmp.ge.s32.totalorder %s4730_s27, 1  ;;  %p241_p8 = scmp.lt.s32.totalorder %s4730_s27, 3 }
   0xc   : > { %p242_p9 = pnand %p3472_p7, %p241_p8 }
   0xd   : > { %s3474_s13 = sshll.u32 (!%p242_p9), %s4797_s28, 3  ;;  %v4732_v0 = vmov (!%p242_p9), 0.0   ;;  %v4733_v1 = vmov (!%p242_p9), 0   ;;  %v296_v2 = vld [vmem:[%s5909_s2] sm:$0xff] (!%p242_p9)  ;;  %v298_v3 = vld [vmem:[%s5909_s2 + $0x10] sm:$0xff] (!%p242_p9)  ;;  %vm387_vm0 = vcmask (!%p242_p9), 1044480  }
   0xe   : > { %245 = sbr.rel (%p242_p9) target bundleno = 1603 (0x643), region = 48  ;;  %p274_p10 = scmp.lt.s32.totalorder (!%p242_p9), %s3474_s13, 15  ;;  %476 = vmatprep.mubr.f32.mxu0 (!%p242_p9), %v4732_v0  ;;  %589 = vmatprep.mubr.f32.mxu1 (!%p242_p9), %v4732_v0  ;;  %v4839_v4 = vld [vmem:[%s5908_s1] sm:$0xff] (!%p242_p9)  ;;  %vm362_vm1 = vcmask (!%p242_p9), 39936   ;;  %v4854_v13 = vld [vmem:[%s5908_s1 + $0x8] sm:$0xff] (!%p242_p9)  ;;  %v299_v15 = vld [vmem:[%s5909_s2 + $0x18] sm:$0xff] (!%p242_p9) }
   0xf   : > { %4016 = vset.pattern.permute.xlu0 (!%p242_p9), %v4733_v1  ;;  %4017 = vset.pattern.permute.xlu1 (!%p242_p9), %v4733_v1  ;;  %v297_v14 = vld [vmem:[%s5909_s2 + $0x8] sm:$0xff] (!%p242_p9)  ;;  %v4875_v16 = vld [vmem:[%s5908_s1 + $0x10] sm:$0xff] (!%p242_p9)  ;;  %v300_v17 = vld [vmem:[%s5909_s2 + $0x20] sm:$0xff] (!%p242_p9)  ;;  %vm968_vm2 = vcmask (!%p242_p9), 523264   ;;  %s270_s22 = sand.u32 (!%p242_p9), 1, %s4722_s25   ;;  %s3653_s8 = sshll.u32 (!%p242_p9), %s4797_s28, 8 }
  0x10   : > { %324 = vperm.xlu0 (!%p242_p9), %4016, %v296_v2   ;;  %334 = vperm.xlu1 (!%p242_p9), %4017, %v298_v3   ;;  %v301_v18 = vld [vmem:[%s5909_s2 + $0x28] sm:$0xff] (!%p242_p9)  ;;  %v291_v19 = vld [vmem:[%s5908_s1 + $0x18] sm:$0xff] (!%p242_p9)  ;;  %v302_v20 = vld [vmem:[%s5909_s2 + $0x30] sm:$0xff] (!%p242_p9)  ;;  %s3473_s23 = sshll.u32 (!%p242_p9), %s270_s22, 4  ;;  %s5865_s15 = scalar_lea.hbm (!%p242_p9), %s5914_s7, %s3653_s8 }
  0x11   : > { %v303_v21 = vld [vmem:[%s5909_s2 + $0x38] sm:$0xff] (!%p242_p9)  ;;  %v292_v22 = vld [vmem:[%s5908_s1 + $0x20] sm:$0xff] (!%p242_p9)  ;;  %v313_v24 = vld [vmem:[%s5911_s4 + $0x8] sm:$0xff] (!%p242_p9)  ;;  %s272_s29 = scalar_lea.vmem (!%p242_p9), [#allocation2], %s3473_s23  ;;  %s3396_s16 = scalar_lea.sflag (!%p242_p9), [#allocation3], %s270_s22 }
  0x12   : > { %v312_v23 = vld [vmem:[%s5911_s4] sm:$0xff] (!%p242_p9)  ;;  %v293_v25 = vld [vmem:[%s5908_s1 + $0x28] sm:$0xff] (!%p242_p9)  ;;  %v314_v26 = vld [vmem:[%s5911_s4 + $0x10] sm:$0xff] (!%p242_p9)  ;;  %s3410_s9 = sshll.u32 (!%p242_p9), %s272_s29, 4  ;;  %s4735_s28 = smov (!%p242_p9), [#allocation2]   ;;  %s5867_s9 = int_to_ptr.vmem [resolvable:$true] %s3410_s9 }
  0x13   : > { %v315_v27 = vld [vmem:[%s5911_s4 + $0x18] sm:$0xff] (!%p242_p9)  ;;  %v294_v28 = vld [vmem:[%s5908_s1 + $0x30] sm:$0xff] (!%p242_p9)  ;;  %v316_v29 = vld [vmem:[%s5911_s4 + $0x20] sm:$0xff] (!%p242_p9)  ;;  %s4668_s17 = scalar_lea.vmem (!%p242_p9), %s5867_s9, 256 }
  0x14   : > { %329 = vperm.xlu0 (!%p242_p9), %4016, %v297_v14   ;;  %339 = vperm.xlu1 (!%p242_p9), %4017, %v299_v15   ;;  %v317_v30 = vld [vmem:[%s5911_s4 + $0x28] sm:$0xff] (!%p242_p9)  ;;  %v295_v31 = vld [vmem:[%s5908_s1 + $0x38] sm:$0xff] (!%p242_p9)  ;;  %v318_v32 = vld [vmem:[%s5911_s4 + $0x30] sm:$0xff] (!%p242_p9)  ;;  %p4669_p11 = scmp.ne.s32.totalorder (!%p242_p9), %s5867_s9, %s4668_s17 }
  0x15   : > { %s5922_s13 = smov (!%p274_p10, %s3474_s13), 15  ;;  %v319_v33 = vld [vmem:[%s5911_s4 + $0x38] sm:$0xff]  ;;  %v321_v34 = vld [vmem:[%s5913_s6] sm:$0x3] }
  0x16   : > { %s3475_s18 = sshll.u32 %s5922_s13, 3  ;;  %p4670_p12 = pnand %p4669_p11, %p4814_p5 }
  0x17   : > { %s277_s21 = scalar_lea.vmem %s5907_s0, %s3475_s18  ;;  %s4672_s18 = sshll.u32 %s4735_s28, 4  ;;  %s4673_s18 = int_to_ptr.vmem [resolvable:$false] %s4672_s18 }
  0x18   : > { %v281_v5 = vld [vmem:[%s277_s21 + $0x8] sm:$0x1f]  ;;  %v283_v6 = vld [vmem:[%s277_s21 + $0x18] sm:$0x1f]  ;;  %v280_v7 = vld [vmem:[%s277_s21] sm:$0x1f]  ;;  %344 = vperm.xlu0 %4016, %v300_v17   ;;  %349 = vperm.xlu1 %4017, %v301_v18   ;;  %p4671_p13 = pneg %p4670_p12  ;;  %p4675_p0 = scmp.lt.s32.totalorder %s5867_s9, %s4673_s18 }
  0x19   : > { %3476 = vmatprep.subr.msk.mxu0 %vm387_vm0, %v281_v5  ;;  %3486 = vmatprep.subr.msk.mxu1 %vm387_vm0, %v283_v6  ;;  %v282_v8 = vld [vmem:[%s277_s21 + $0x10] sm:$0x1f]  ;;  %v285_v9 = vld [vmem:[%s277_s21 + $0x28] sm:$0x1f]  ;;  %v287_v10 = vld [vmem:[%s277_s21 + $0x38] sm:$0x1f] }
  0x1a   : > { %3477 = vmatpush1.msk.msra.mxu0 %vm387_vm0, %v280_v7  ;;  %3487 = vmatpush1.msk.msra.mxu1 %vm387_vm0, %v282_v8  ;;  %v284_v11 = vld [vmem:[%s277_s21 + $0x20] sm:$0x1f]  ;;  %v286_v12 = vld [vmem:[%s277_s21 + $0x30] sm:$0x1f]  ;;  %s4674_s19 = scalar_lea.vmem %s4673_s18, 512 }
  0x1b   : > { %3478 = vmatmul.mubr.msk.f32.vlgmr.msra.gmra.mrb[0].mxu0 %vm362_vm1, %v4839_v4  ;;  %3488 = vmatmul.mubr.msk.f32.vlgmr.msra.gmra.mrb[0].mxu1 %vm362_vm1, %v4839_v4  ;;  %p4676_p1 = scmp.lt.s32.totalorder %s4674_s19, %s4668_s17 }
  0x1c   : > { %482 = vmatprep.mubr.f32.mxu0 %v4732_v0  ;;  %595 = vmatprep.mubr.f32.mxu1 %v4732_v0 }
  0x1d   : > { %3496 = vmatprep.subr.msk.mxu0 %vm387_vm0, %v285_v9  ;;  %3506 = vmatprep.subr.msk.mxu1 %vm387_vm0, %v287_v10  ;;  %p4677_p2 = por %p4676_p1, %p4675_p0 }
  0x1e   : > { %3497 = vmatpush1.msk.msra.mxu0 %vm387_vm0, %v284_v11  ;;  %3507 = vmatpush1.msk.msra.mxu1 %vm387_vm0, %v286_v12 }
  0x1f   : > { %3479 = vmatmul.mubr.msk.f32.gmra.mrb[2].mxu0 %vm362_vm1, %v4854_v13  ;;  %3489 = vmatmul.mubr.msk.f32.gmra.mrb[2].mxu1 %vm362_vm1, %v4854_v13  ;;  %p4678_p3 = pnand %p4677_p2, %p4671_p13 }
  0x20   : > { %488 = vmatprep.mubr.f32.mxu0 %v4732_v0  ;;  %601 = vmatprep.mubr.f32.mxu1 %v4732_v0 }
  0x21   : > { %354 = vperm.xlu0 %4016, %v302_v20   ;;  %359 = vperm.xlu1 %4017, %v303_v21  }
  0x23   : > { %3480 = vmatmul.mubr.msk.f32.gmra.mrb[4].mxu0 %vm362_vm1, %v4875_v16  ;;  %3490 = vmatmul.mubr.msk.f32.gmra.mrb[4].mxu1 %vm362_vm1, %v4875_v16 }
  0x24   : > { %494 = vmatprep.mubr.f32.mxu0 %v4732_v0  ;;  %607 = vmatprep.mubr.f32.mxu1 %v4732_v0 }
  0x25   : > { %930 = vperm.xlu0 %4016, %v312_v23   ;;  %935 = vperm.xlu1 %4017, %v313_v24  }
  0x27   : > { %3481 = vmatmul.mubr.msk.f32.gmra.mrb[6].mxu0 %vm362_vm1, %v291_v19  ;;  %3491 = vmatmul.mubr.msk.f32.gmra.mrb[6].mxu1 %vm362_vm1, %v291_v19 }
  0x28   : > { %500 = vmatprep.mubr.f32.mxu0 %v4732_v0  ;;  %613 = vmatprep.mubr.f32.mxu1 %v4732_v0 }
  0x29   : > { %940 = vperm.xlu0 %4016, %v314_v26   ;;  %945 = vperm.xlu1 %4017, %v315_v27  }
  0x2b   : > { %3482 = vmatmul.mubr.msk.f32.gmra.mrb[8].mxu0 %vm362_vm1, %v292_v22  ;;  %3492 = vmatmul.mubr.msk.f32.gmra.mrb[8].mxu1 %vm362_vm1, %v292_v22 }
  0x2c   : > { %506 = vmatprep.mubr.f32.mxu0 %v4732_v0  ;;  %619 = vmatprep.mubr.f32.mxu1 %v4732_v0 }
  0x2d   : > { %950 = vperm.xlu0 %4016, %v316_v29   ;;  %955 = vperm.xlu1 %4017, %v317_v30  }
  0x2f   : > { %3483 = vmatmul.mubr.msk.f32.gmra.mrb[10].mxu0 %vm362_vm1, %v293_v25  ;;  %3493 = vmatmul.mubr.msk.f32.gmra.mrb[10].mxu1 %vm362_vm1, %v293_v25 }
  0x30   : > { %512 = vmatprep.mubr.f32.mxu0 %v4732_v0  ;;  %625 = vmatprep.mubr.f32.mxu1 %v4732_v0 }
  0x31   : > { %960 = vperm.xlu0 %4016, %v318_v32   ;;  %965 = vperm.xlu1 %4017, %v319_v33  }
  0x33   : > { %3484 = vmatmul.mubr.msk.f32.gmra.mrb[12].mxu0 %vm362_vm1, %v294_v28  ;;  %3494 = vmatmul.mubr.msk.f32.gmra.mrb[12].mxu1 %vm362_vm1, %v294_v28 }
  0x34   : > { %518 = vmatprep.mubr.f32.mxu0 %v4732_v0  ;;  %631 = vmatprep.mubr.f32.mxu1 %v4732_v0 }
  0x35   : > { %3059 = vperm.xlu0 %4016, %v321_v34  }
  0x37   : > { %3485 = vmatmul.mubr.msk.f32.gmra.mrb[14].mxu0 %vm362_vm1, %v295_v31  ;;  %3495 = vmatmul.mubr.msk.f32.gmra.mrb[14].mxu1 %vm362_vm1, %v295_v31 }
  0x38   : > { %702 = vmatprep.mubr.f32.mxu0 %v4732_v0  ;;  %815 = vmatprep.mubr.f32.mxu1 %v4732_v0 }
  0x3b   : > { %3498 = vmatmul.mubr.msk.f32.vlgmr.msra.gmra.mrb[16].mxu0 %vm362_vm1, %v4839_v4  ;;  %3508 = vmatmul.mubr.msk.f32.vlgmr.msra.gmra.mrb[16].mxu1 %vm362_vm1, %v4839_v4 }
  0x3c   : > { %708 = vmatprep.mubr.f32.mxu0 %v4732_v0  ;;  %821 = vmatprep.mubr.f32.mxu1 %v4732_v0 }
  0x3f   : > { %3499 = vmatmul.mubr.msk.f32.gmra.mrb[18].mxu0 %vm362_vm1, %v4854_v13  ;;  %3509 = vmatmul.mubr.msk.f32.gmra.mrb[18].mxu1 %vm362_vm1, %v4854_v13 }
  0x40   : > { %714 = vmatprep.mubr.f32.mxu0 %v4732_v0  ;;  %827 = vmatprep.mubr.f32.mxu1 %v4732_v0 }
  0x43   : > { %3500 = vmatmul.mubr.msk.f32.gmra.mrb[20].mxu0 %vm362_vm1, %v4875_v16  ;;  %3510 = vmatmul.mubr.msk.f32.gmra.mrb[20].mxu1 %vm362_vm1, %v4875_v16 }
  0x44   : > { %720 = vmatprep.mubr.f32.mxu0 %v4732_v0  ;;  %833 = vmatprep.mubr.f32.mxu1 %v4732_v0 }
  0x47   : > { %3501 = vmatmul.mubr.msk.f32.gmra.mrb[22].mxu0 %vm362_vm1, %v291_v19  ;;  %3511 = vmatmul.mubr.msk.f32.gmra.mrb[22].mxu1 %vm362_vm1, %v291_v19 }
  0x48   : > { %726 = vmatprep.mubr.f32.mxu0 %v4732_v0  ;;  %839 = vmatprep.mubr.f32.mxu1 %v4732_v0 }
  0x4b   : > { %3502 = vmatmul.mubr.msk.f32.gmra.mrb[24].mxu0 %vm362_vm1, %v292_v22  ;;  %3512 = vmatmul.mubr.msk.f32.gmra.mrb[24].mxu1 %vm362_vm1, %v292_v22 }
  0x4c   : > { %732 = vmatprep.mubr.f32.mxu0 %v4732_v0  ;;  %845 = vmatprep.mubr.f32.mxu1 %v4732_v0 }
  0x4f   : > { %3503 = vmatmul.mubr.msk.f32.gmra.mrb[26].mxu0 %vm362_vm1, %v293_v25  ;;  %3513 = vmatmul.mubr.msk.f32.gmra.mrb[26].mxu1 %vm362_vm1, %v293_v25 }
  0x50   : > { %738 = vmatprep.mubr.f32.mxu0 %v4732_v0  ;;  %851 = vmatprep.mubr.f32.mxu1 %v4732_v0 }
  0x53   : > { %3504 = vmatmul.mubr.msk.f32.gmra.mrb[28].mxu0 %vm362_vm1, %v294_v28  ;;  %3514 = vmatmul.mubr.msk.f32.gmra.mrb[28].mxu1 %vm362_vm1, %v294_v28 }
  0x54   : > { %744 = vmatprep.mubr.f32.mxu0 %v4732_v0  ;;  %857 = vmatprep.mubr.f32.mxu1 %v4732_v0 }
  0x57   : > { %3505 = vmatmul.mubr.msk.f32.gmra.mrb[30].mxu0 %vm362_vm1, %v295_v31  ;;  %3515 = vmatmul.mubr.msk.f32.gmra.mrb[30].mxu1 %vm362_vm1, %v295_v31 }
  0x58   : > { %1057 = vmatprep.mubr.f32.mxu0 %v4732_v0  ;;  %1170 = vmatprep.mubr.f32.mxu1 %v4732_v0 }
  0x8f   : > { %v4995_v35 = vpop.permute.xlu0 %324  ;;  %v5003_v45 = vpop.permute.xlu1 %334 }
  0x93   : > { %v5001_v44 = vpop.permute.xlu0 %329  ;;  %v5013_v62 = vpop.permute.xlu1 %339 }
  0x97   : > { %v5019_v11 = vpop.permute.xlu0 %344  ;;  %v5025_v25 = vpop.permute.xlu1 %349 }
  0xee   : > { %v478_v36 = vpop.f32.mrb[0].mxu0  ;;  %v591_v37 = vpop.f32.mrb[0].mxu1 }
  0xef   : > { %v479_v38 = vadd.f32 %v478_v36, %v4995_v35  ;;  %v592_v39 = vadd.f32 %v591_v37, %v4995_v35  ;;  %v480_v40 = vpop.f32.mrb[1].mxu0  ;;  %v593_v41 = vpop.f32.mrb[1].mxu1 }
  0xf0   : > { %v481_v42 = vadd.f32 %v480_v40, %v4995_v35  ;;  %v594_v43 = vadd.f32 %v593_v41, %v4995_v35 }
  0xf1   : > { %4018 = vtanh.f32 %v479_v38 }
  0xf2   : > { %4020 = vtanh.f32 %v592_v39  ;;  %v484_v46 = vpop.f32.mrb[2].mxu0  ;;  %v597_v47 = vpop.f32.mrb[2].mxu1 }
  0xf3   : > { %4022 = vtanh.f32 %v481_v42  ;;  %v485_v48 = vadd.f32 %v484_v46, %v5001_v44  ;;  %v598_v49 = vadd.f32 %v597_v47, %v5001_v44  ;;  %v486_v50 = vpop.f32.mrb[3].mxu0  ;;  %v599_v51 = vpop.f32.mrb[3].mxu1 }
  0xf4   : > { %4024 = vtanh.f32 %v594_v43  ;;  %v487_v52 = vadd.f32 %v486_v50, %v5001_v44  ;;  %v600_v53 = vadd.f32 %v599_v51, %v5001_v44  ;;  %v5031_v42 = vpop.permute.xlu0 %354 }
  0xf5   : > { %4026 = vtanh.f32 %v485_v48 }
  0xf6   : > { %4028 = vtanh.f32 %v598_v49  ;;  %v490_v54 = vpop.f32.mrb[4].mxu0  ;;  %v603_v55 = vpop.f32.mrb[4].mxu1 }
  0xf7   : > { %4030 = vtanh.f32 %v487_v52  ;;  %v491_v56 = vadd.f32 %v490_v54, %v5003_v45  ;;  %v604_v57 = vadd.f32 %v603_v55, %v5003_v45  ;;  %v492_v58 = vpop.f32.mrb[5].mxu0  ;;  %v605_v59 = vpop.f32.mrb[5].mxu1 }
  0xf8   : > { %4032 = vtanh.f32 %v600_v53  ;;  %v493_v60 = vadd.f32 %v492_v58, %v5003_v45  ;;  %v606_v61 = vadd.f32 %v605_v59, %v5003_v45  ;;  %v5037_v58 = vpop.permute.xlu1 %359 }
  0xf9   : > { %4034 = vtanh.f32 %v491_v56 }
  0xfa   : > { %4036 = vtanh.f32 %v604_v57  ;;  %v496_v63 = vpop.f32.mrb[6].mxu0  ;;  %v609_v1 = vpop.f32.mrb[6].mxu1 }
  0xfb   : > { %v4019_v2 = vpop.eup %4018  ;;  %4038 = vtanh.f32 %v493_v60  ;;  %v497_v3 = vadd.f32 %v496_v63, %v5013_v62  ;;  %v610_v4 = vadd.f32 %v609_v1, %v5013_v62  ;;  %v498_v5 = vpop.f32.mrb[7].mxu0 }
  0xfc   : > { %v611_v6 = vpop.f32.mrb[7].mxu1  ;;  %v4021_v7 = vpop.eup %4020  ;;  %4040 = vtanh.f32 %v606_v61  ;;  %v499_v8 = vadd.f32 %v498_v5, %v5013_v62 }
  0xfd   : > { %v612_v9 = vadd.f32 %v611_v6, %v5013_v62  ;;  %v4023_v10 = vpop.eup %4022  ;;  %4042 = vtanh.f32 %v497_v3 }
  0xfe   : > { %v4025_v12 = vpop.eup %4024  ;;  %4044 = vtanh.f32 %v610_v4  ;;  %v502_v13 = vpop.f32.mrb[8].mxu0 }
  0xff   : > { %v615_v14 = vpop.f32.mrb[8].mxu1  ;;  %v4027_v15 = vpop.eup %4026  ;;  %4046 = vtanh.f32 %v499_v8  ;;  %v503_v16 = vadd.f32 %v502_v13, %v5019_v11 }
 0x100   : > { %v616_v17 = vadd.f32 %v615_v14, %v5019_v11  ;;  %v504_v18 = vpop.f32.mrb[9].mxu0  ;;  %v617_v19 = vpop.f32.mrb[9].mxu1  ;;  %4048 = vtanh.f32 %v612_v9  ;;  %v3656_v23 = vpack.c.bf16 %v4027_v15, %v4019_v2 }
 0x101   : > { %v4029_v20 = vpop.eup %4028  ;;  %v505_v21 = vadd.f32 %v504_v18, %v5019_v11  ;;  %v618_v22 = vadd.f32 %v617_v19, %v5019_v11  ;;  %4050 = vtanh.f32 %v503_v16 }
 0x102   : > { %v4031_v24 = vpop.eup %4030  ;;  %v3672_v26 = vpack.c.bf16 %v4029_v20, %v4021_v7  ;;  %4052 = vtanh.f32 %v616_v17  ;;  %v508_v28 = vpop.f32.mrb[10].mxu0 }
 0x103   : > { %v4033_v27 = vpop.eup %4032  ;;  %v621_v29 = vpop.f32.mrb[10].mxu1  ;;  %v3654_v30 = vpack.c.bf16 %v4031_v24, %v4023_v10  ;;  %4054 = vtanh.f32 %v505_v21  ;;  %v509_v32 = vadd.f32 %v508_v28, %v5025_v25 }
 0x104   : > { %v4035_v31 = vpop.eup %4034  ;;  %v622_v33 = vadd.f32 %v621_v29, %v5025_v25  ;;  %v510_v34 = vpop.f32.mrb[11].mxu0  ;;  %v3670_v37 = vpack.c.bf16 %v4033_v27, %v4025_v12  ;;  %4056 = vtanh.f32 %v618_v22 }
 0x105   : > { %v623_v36 = vpop.f32.mrb[11].mxu1  ;;  %v4037_v38 = vpop.eup %4036  ;;  %v511_v39 = vadd.f32 %v510_v34, %v5025_v25  ;;  %3655 = vmatprep.subr.bf16.mxu0 %v3654_v30  ;;  %4058 = vtanh.f32 %v509_v32 }
 0x106   : > { %v624_v40 = vadd.f32 %v623_v36, %v5025_v25  ;;  %v4039_v41 = vpop.eup %4038  ;;  %3671 = vmatprep.subr.bf16.mxu1 %v3670_v37  ;;  %3657 = vmatpush1.bf16.msra.mxu0 %v3656_v23  ;;  %4060 = vtanh.f32 %v622_v33  ;;  %v514_v46 = vpop.f32.mrb[12].mxu0 }
 0x107   : > { %v4041_v43 = vpop.eup %4040  ;;  %3673 = vmatpush1.bf16.msra.mxu1 %v3672_v26  ;;  %v627_v47 = vpop.f32.mrb[12].mxu1  ;;  %4062 = vtanh.f32 %v511_v39  ;;  %v515_v49 = vadd.f32 %v514_v46, %v5031_v42 }
 0x108   : > { %v4043_v48 = vpop.eup %4042  ;;  %v628_v50 = vadd.f32 %v627_v47, %v5031_v42  ;;  %v516_v51 = vpop.f32.mrb[13].mxu0  ;;  %4064 = vtanh.f32 %v624_v40 }
 0x109   : > { %v629_v52 = vpop.f32.mrb[13].mxu1  ;;  %v4045_v53 = vpop.eup %4044  ;;  %v517_v54 = vadd.f32 %v516_v51, %v5031_v42  ;;  %v3660_v56 = vpack.c.bf16 %v4043_v48, %v4035_v31  ;;  %4066 = vtanh.f32 %v515_v49 }
 0x10a   : > { %v630_v55 = vadd.f32 %v629_v52, %v5031_v42  ;;  %v4047_v57 = vpop.eup %4046  ;;  %v3676_v59 = vpack.c.bf16 %v4045_v53, %v4037_v38  ;;  %4068 = vtanh.f32 %v628_v50  ;;  %v520_v61 = vpop.f32.mrb[14].mxu0 }
 0x10b   : > { %v4049_v60 = vpop.eup %4048  ;;  %v633_v63 = vpop.f32.mrb[14].mxu1  ;;  %v3658_v1 = vpack.c.bf16 %v4047_v57, %v4039_v41  ;;  %4070 = vtanh.f32 %v517_v54  ;;  %v521_v3 = vadd.f32 %v520_v61, %v5037_v58 }
 0x10c   : > { %v4051_v2 = vpop.eup %4050  ;;  %v634_v4 = vadd.f32 %v633_v63, %v5037_v58  ;;  %v522_v5 = vpop.f32.mrb[15].mxu0  ;;  %v3674_v7 = vpack.c.bf16 %v4049_v60, %v4041_v43  ;;  %4072 = vtanh.f32 %v630_v55 }
 0x10d   : > { %v635_v6 = vpop.f32.mrb[15].mxu1  ;;  %v4053_v8 = vpop.eup %4052  ;;  %v523_v9 = vadd.f32 %v522_v5, %v5037_v58  ;;  %3659 = vmatprep.subr.bf16.mxu0 %v3658_v1  ;;  %4074 = vtanh.f32 %v521_v3 }
 0x10e   : > { %v636_v10 = vadd.f32 %v635_v6, %v5037_v58  ;;  %v4055_v12 = vpop.eup %4054  ;;  %3675 = vmatprep.subr.bf16.mxu1 %v3674_v7  ;;  %3661 = vmatpush1.bf16.msra.mxu0 %v3660_v56  ;;  %4076 = vtanh.f32 %v634_v4  ;;  %v704_v14 = vpop.f32.mrb[16].mxu0 }
 0x10f   : > { %v4057_v13 = vpop.eup %4056  ;;  %3677 = vmatpush1.bf16.msra.mxu1 %v3676_v59  ;;  %v817_v15 = vpop.f32.mrb[16].mxu1  ;;  %4078 = vtanh.f32 %v523_v9  ;;  %v705_v17 = vadd.f32 %v704_v14, %v4995_v35 }
 0x110   : > { %v4059_v16 = vpop.eup %4058  ;;  %v818_v18 = vadd.f32 %v817_v15, %v4995_v35  ;;  %v706_v19 = vpop.f32.mrb[17].mxu0  ;;  %4080 = vtanh.f32 %v636_v10  ;;  %v5064_v10 = vld [vmem:[%s5910_s3] sm:$0xff] }
 0x111   : > { %v819_v20 = vpop.f32.mrb[17].mxu1  ;;  %v4061_v21 = vpop.eup %4060  ;;  %v707_v22 = vadd.f32 %v706_v19, %v4995_v35  ;;  %v3664_v24 = vpack.c.bf16 %v4059_v16, %v4051_v2  ;;  %4082 = vtanh.f32 %v705_v17 }
 0x112   : > { %v820_v23 = vadd.f32 %v819_v20, %v4995_v35  ;;  %v4063_v26 = vpop.eup %4062  ;;  %v3680_v27 = vpack.c.bf16 %v4061_v21, %v4053_v8  ;;  %4084 = vtanh.f32 %v818_v18  ;;  %v710_v29 = vpop.f32.mrb[18].mxu0 }
 0x113   : > { %v4065_v28 = vpop.eup %4064  ;;  %v823_v30 = vpop.f32.mrb[18].mxu1  ;;  %v3662_v31 = vpack.c.bf16 %v4063_v26, %v4055_v12  ;;  %4086 = vtanh.f32 %v707_v22  ;;  %v711_v33 = vadd.f32 %v710_v29, %v5001_v44 }
 0x114   : > { %v4067_v32 = vpop.eup %4066  ;;  %v824_v34 = vadd.f32 %v823_v30, %v5001_v44  ;;  %v712_v36 = vpop.f32.mrb[19].mxu0  ;;  %v3678_v38 = vpack.c.bf16 %v4065_v28, %v4057_v13  ;;  %4088 = vtanh.f32 %v820_v23 }
 0x115   : > { %v825_v37 = vpop.f32.mrb[19].mxu1  ;;  %v4069_v39 = vpop.eup %4068  ;;  %v713_v35 = vadd.f32 %v712_v36, %v5001_v44  ;;  %3663 = vmatprep.subr.bf16.mxu0 %v3662_v31  ;;  %4090 = vtanh.f32 %v711_v33 }
 0x116   : > { %v826_v40 = vadd.f32 %v825_v37, %v5001_v44  ;;  %v4071_v41 = vpop.eup %4070  ;;  %3679 = vmatprep.subr.bf16.mxu1 %v3678_v38  ;;  %3665 = vmatpush1.bf16.msra.mxu0 %v3664_v24  ;;  %4092 = vtanh.f32 %v824_v34  ;;  %v716_v46 = vpop.f32.mrb[20].mxu0  ;;  %v5079_v24 = vld [vmem:[%s5910_s3 + $0x8] sm:$0xff] }
 0x117   : > { %v4073_v43 = vpop.eup %4072  ;;  %3681 = vmatpush1.bf16.msra.mxu1 %v3680_v27  ;;  %v829_v47 = vpop.f32.mrb[20].mxu1  ;;  %4094 = vtanh.f32 %v713_v35  ;;  %v717_v49 = vadd.f32 %v716_v46, %v5003_v45 }
 0x118   : > { %v4075_v48 = vpop.eup %4074  ;;  %v830_v50 = vadd.f32 %v829_v47, %v5003_v45  ;;  %v718_v51 = vpop.f32.mrb[21].mxu0  ;;  %4096 = vtanh.f32 %v826_v40  ;;  %v5097_v40 = vld [vmem:[%s5910_s3 + $0x10] sm:$0xff] }
 0x119   : > { %v831_v52 = vpop.f32.mrb[21].mxu1  ;;  %v4077_v53 = vpop.eup %4076  ;;  %v719_v44 = vadd.f32 %v718_v51, %v5003_v45  ;;  %v3668_v55 = vpack.c.bf16 %v4075_v48, %v4067_v32  ;;  %4098 = vtanh.f32 %v717_v49 }
 0x11a   : > { %v832_v54 = vadd.f32 %v831_v52, %v5003_v45  ;;  %v4079_v56 = vpop.eup %4078  ;;  %v3684_v57 = vpack.c.bf16 %v4077_v53, %v4069_v39  ;;  %4100 = vtanh.f32 %v830_v50  ;;  %v722_v60 = vpop.f32.mrb[22].mxu0 }
 0x11b   : > { %v4081_v59 = vpop.eup %4080  ;;  %v835_v61 = vpop.f32.mrb[22].mxu1  ;;  %v3666_v63 = vpack.c.bf16 %v4079_v56, %v4071_v41  ;;  %4102 = vtanh.f32 %v719_v44  ;;  %v723_v2 = vadd.f32 %v722_v60, %v5013_v62 }
 0x11c   : > { %v5055_v1 = vpop.eup %4082  ;;  %v836_v3 = vadd.f32 %v835_v61, %v5013_v62  ;;  %v724_v4 = vpop.f32.mrb[23].mxu0  ;;  %v3682_v6 = vpack.c.bf16 %v4081_v59, %v4073_v43  ;;  %4104 = vtanh.f32 %v832_v54 }
 0x11d   : > { %v837_v5 = vpop.f32.mrb[23].mxu1  ;;  %v4085_v45 = vpop.eup %4084  ;;  %v725_v7 = vadd.f32 %v724_v4, %v5013_v62  ;;  %3667 = vmatprep.subr.bf16.mxu0 %v3666_v63  ;;  %4106 = vtanh.f32 %v723_v2 }
 0x11e   : > { %v838_v8 = vadd.f32 %v837_v5, %v5013_v62  ;;  %v4087_v9 = vpop.eup %4086  ;;  %3683 = vmatprep.subr.bf16.mxu1 %v3682_v6  ;;  %3669 = vmatpush1.bf16.msra.mxu0 %v3668_v55  ;;  %4108 = vtanh.f32 %v836_v3  ;;  %v728_v13 = vpop.f32.mrb[24].mxu0  ;;  %v5114_v55 = vld [vmem:[%s5910_s3 + $0x18] sm:$0xff] }
 0x11f   : > { %v4089_v12 = vpop.eup %4088  ;;  %3685 = vmatpush1.bf16.msra.mxu1 %v3684_v57  ;;  %v841_v14 = vpop.f32.mrb[24].mxu1  ;;  %4110 = vtanh.f32 %v725_v7  ;;  %v729_v62 = vadd.f32 %v728_v13, %v5019_v11 }
 0x120   : > { %v4091_v15 = vpop.eup %4090  ;;  %v842_v16 = vadd.f32 %v841_v14, %v5019_v11  ;;  %v730_v17 = vpop.f32.mrb[25].mxu0  ;;  %4112 = vtanh.f32 %v838_v8  ;;  %v5129_v8 = vld [vmem:[%s5910_s3 + $0x20] sm:$0xff] }
 0x121   : > { %v843_v18 = vpop.f32.mrb[25].mxu1  ;;  %v4093_v19 = vpop.eup %4092  ;;  %v731_v20 = vadd.f32 %v730_v17, %v5019_v11  ;;  %3516 = vmatmul.mubr.msk.f32.vlgmr.msra.gmra.mrb[32].mxu0 %vm968_vm2, %v5064_v10  ;;  %v3688_v22 = vpack.c.bf16 %v4091_v15, %v5055_v1  ;;  %4114 = vtanh.f32 %v729_v62  ;;  %v5141_v15 = vld [vmem:[%s5910_s3 + $0x28] sm:$0xff] }
 0x122   : > { %v844_v21 = vadd.f32 %v843_v18, %v5019_v11  ;;  %v4095_v23 = vpop.eup %4094  ;;  %3524 = vmatmul.mubr.msk.f32.vlgmr.msra.gmra.mrb[32].mxu1 %vm968_vm2, %v5064_v10  ;;  %1063 = vmatprep.mubr.f32.mxu0 %v4732_v0  ;;  %v3704_v26 = vpack.c.bf16 %v4093_v19, %v4085_v45  ;;  %4116 = vtanh.f32 %v842_v16  ;;  %v734_v11 = vpop.f32.mrb[26].mxu0 }
 0x123   : > { %v4097_v27 = vpop.eup %4096  ;;  %v847_v28 = vpop.f32.mrb[26].mxu1  ;;  %1176 = vmatprep.mubr.f32.mxu1 %v4732_v0  ;;  %v3686_v29 = vpack.c.bf16 %v4095_v23, %v4087_v9  ;;  %4118 = vtanh.f32 %v731_v20  ;;  %v735_v31 = vadd.f32 %v734_v11, %v5025_v25 }
 0x124   : > { %v5082_v30 = vpop.eup %4098  ;;  %v848_v32 = vadd.f32 %v847_v28, %v5025_v25  ;;  %v736_v33 = vpop.f32.mrb[27].mxu0  ;;  %v3702_v36 = vpack.c.bf16 %v4097_v27, %v4089_v12  ;;  %4120 = vtanh.f32 %v844_v21 }
 0x125   : > { %v849_v34 = vpop.f32.mrb[27].mxu1  ;;  %v5086_v37 = vpop.eup %4100  ;;  %v737_v38 = vadd.f32 %v736_v33, %v5025_v25  ;;  %3517 = vmatmul.mubr.msk.f32.gmra.mrb[34].mxu0 %vm968_vm2, %v5079_v24  ;;  %3687 = vmatprep.subr.bf16.mxu0 %v3686_v29  ;;  %4122 = vtanh.f32 %v735_v31  ;;  %v5163_v29 = vld [vmem:[%s5910_s3 + $0x38] sm:$0xff] }
 0x126   : > { %v850_v39 = vadd.f32 %v849_v34, %v5025_v25  ;;  %v4103_v35 = vpop.eup %4102  ;;  %3525 = vmatmul.mubr.msk.f32.gmra.mrb[34].mxu1 %vm968_vm2, %v5079_v24  ;;  %3703 = vmatprep.subr.bf16.mxu1 %v3702_v36  ;;  %4124 = vtanh.f32 %v848_v32  ;;  %v740_v25 = vpop.f32.mrb[28].mxu0 }
 0x127   : > { %v4105_v41 = vpop.eup %4104  ;;  %3689 = vmatpush1.bf16.msra.mxu0 %v3688_v22  ;;  %3705 = vmatpush1.bf16.msra.mxu1 %v3704_v26  ;;  %v853_v43 = vpop.f32.mrb[28].mxu1  ;;  %4126 = vtanh.f32 %v737_v38  ;;  %v741_v47 = vadd.f32 %v740_v25, %v5031_v42  ;;  %v5151_v22 = vld [vmem:[%s5910_s3 + $0x30] sm:$0xff] }
 0x128   : > { %v4107_v46 = vpop.eup %4106  ;;  %v854_v48 = vadd.f32 %v853_v43, %v5031_v42  ;;  %1069 = vmatprep.mubr.f32.mxu0 %v4732_v0  ;;  %1182 = vmatprep.mubr.f32.mxu1 %v4732_v0  ;;  %v742_v49 = vpop.f32.mrb[29].mxu0  ;;  %4128 = vtanh.f32 %v850_v39 }
 0x129   : > { %v855_v50 = vpop.f32.mrb[29].mxu1  ;;  %v4109_v51 = vpop.eup %4108  ;;  %v743_v52 = vadd.f32 %v742_v49, %v5031_v42  ;;  %3518 = vmatmul.mubr.msk.f32.gmra.mrb[36].mxu0 %vm968_vm2, %v5097_v40  ;;  %v3692_v44 = vpack.c.bf16 %v4107_v46, %v5082_v30  ;;  %4130 = vtanh.f32 %v741_v47 }
 0x12a   : > { %v856_v53 = vadd.f32 %v855_v50, %v5031_v42  ;;  %v4111_v54 = vpop.eup %4110  ;;  %3526 = vmatmul.mubr.msk.f32.gmra.mrb[36].mxu1 %vm968_vm2, %v5097_v40  ;;  %1075 = vmatprep.mubr.f32.mxu0 %v4732_v0  ;;  %v3708_v56 = vpack.c.bf16 %v4109_v51, %v5086_v37  ;;  %4132 = vtanh.f32 %v854_v48  ;;  %v746_v57 = vpop.f32.mrb[30].mxu0 }
 0x12b   : > { %v4113_v42 = vpop.eup %4112  ;;  %v859_v59 = vpop.f32.mrb[30].mxu1  ;;  %1188 = vmatprep.mubr.f32.mxu1 %v4732_v0  ;;  %v3690_v60 = vpack.c.bf16 %v4111_v54, %v4103_v35  ;;  %4134 = vtanh.f32 %v743_v52  ;;  %v747_v63 = vadd.f32 %v746_v57, %v5037_v58 }
 0x12c   : > { %v4115_v61 = vpop.eup %4114  ;;  %v860_v1 = vadd.f32 %v859_v59, %v5037_v58  ;;  %v748_v2 = vpop.f32.mrb[31].mxu0  ;;  %v3706_v4 = vpack.c.bf16 %v4113_v42, %v4105_v41  ;;  %4136 = vtanh.f32 %v856_v53 }
 0x12d   : > { %v861_v3 = vpop.f32.mrb[31].mxu1  ;;  %v4117_v5 = vpop.eup %4116  ;;  %v749_v6 = vadd.f32 %v748_v2, %v5037_v58  ;;  %3519 = vmatmul.mubr.msk.f32.gmra.mrb[38].mxu0 %vm968_vm2, %v5114_v55  ;;  %3691 = vmatprep.subr.bf16.mxu0 %v3690_v60  ;;  %4138 = vtanh.f32 %v747_v63 }
 0x12e   : > { %v862_v45 = vadd.f32 %v861_v3, %v5037_v58  ;;  %v4119_v7 = vpop.eup %4118  ;;  %3527 = vmatmul.mubr.msk.f32.gmra.mrb[38].mxu1 %vm968_vm2, %v5114_v55  ;;  %3707 = vmatprep.subr.bf16.mxu1 %v3706_v4  ;;  %4140 = vtanh.f32 %v860_v1  ;;  %v5220_v34 = vpop.permute.xlu0 %930 }
 0x12f   : > { %v4121_v9 = vpop.eup %4120  ;;  %3693 = vmatpush1.bf16.msra.mxu0 %v3692_v44  ;;  %3709 = vmatpush1.bf16.msra.mxu1 %v3708_v56  ;;  %4142 = vtanh.f32 %v749_v6  ;;  %v5226_v46 = vpop.permute.xlu1 %935 }
 0x130   : > { %v4123_v58 = vpop.eup %4122  ;;  %1081 = vmatprep.mubr.f32.mxu0 %v4732_v0  ;;  %1194 = vmatprep.mubr.f32.mxu1 %v4732_v0  ;;  %4144 = vtanh.f32 %v862_v45 }
 0x131   : > { %v4125_v12 = vpop.eup %4124  ;;  %3520 = vmatmul.mubr.msk.f32.gmra.mrb[40].mxu0 %vm968_vm2, %v5129_v8  ;;  %v3696_v13 = vpack.c.bf16 %v4123_v58, %v4115_v61 }
 0x132   : > { %v4127_v14 = vpop.eup %4126  ;;  %3528 = vmatmul.mubr.msk.f32.gmra.mrb[40].mxu1 %vm968_vm2, %v5129_v8  ;;  %1087 = vmatprep.mubr.f32.mxu0 %v4732_v0  ;;  %v3712_v62 = vpack.c.bf16 %v4125_v12, %v4117_v5  ;;  %v5232_v54 = vpop.permute.xlu0 %940 }
 0x133   : > { %v4129_v16 = vpop.eup %4128  ;;  %1200 = vmatprep.mubr.f32.mxu1 %v4732_v0  ;;  %v3694_v17 = vpack.c.bf16 %v4127_v14, %v4119_v7  ;;  %v5238_v2 = vpop.permute.xlu1 %945 }
 0x134   : > { %v4131_v18 = vpop.eup %4130  ;;  %v3710_v19 = vpack.c.bf16 %v4129_v16, %v4121_v9 }
 0x135   : > { %v4133_v20 = vpop.eup %4132  ;;  %3521 = vmatmul.mubr.msk.f32.gmra.mrb[42].mxu0 %vm968_vm2, %v5141_v15  ;;  %3695 = vmatprep.subr.bf16.mxu0 %v3694_v17 }
 0x136   : > { %v4135_v21 = vpop.eup %4134  ;;  %3529 = vmatmul.mubr.msk.f32.gmra.mrb[42].mxu1 %vm968_vm2, %v5141_v15  ;;  %3711 = vmatprep.subr.bf16.mxu1 %v3710_v19  ;;  %v5244_v16 = vpop.permute.xlu0 %950 }
 0x137   : > { %v4137_v23 = vpop.eup %4136  ;;  %3697 = vmatpush1.bf16.msra.mxu0 %v3696_v13  ;;  %3713 = vmatpush1.bf16.msra.mxu1 %v3712_v62 }
 0x138   : > { %v4139_v26 = vpop.eup %4138  ;;  %1093 = vmatprep.mubr.f32.mxu0 %v4732_v0  ;;  %1206 = vmatprep.mubr.f32.mxu1 %v4732_v0 }
 0x139   : > { %v4141_v27 = vpop.eup %4140  ;;  %3522 = vmatmul.mubr.msk.f32.gmra.mrb[44].mxu0 %vm968_vm2, %v5151_v22  ;;  %v3700_v11 = vpack.c.bf16 %v4139_v26, %v4131_v18 }
 0x13a   : > { %v4143_v28 = vpop.eup %4142  ;;  %3530 = vmatmul.mubr.msk.f32.gmra.mrb[44].mxu1 %vm968_vm2, %v5151_v22  ;;  %1099 = vmatprep.mubr.f32.mxu0 %v4732_v0  ;;  %v3716_v30 = vpack.c.bf16 %v4141_v27, %v4133_v20 }
 0x13b   : > { %v4145_v31 = vpop.eup %4144  ;;  %1212 = vmatprep.mubr.f32.mxu1 %v4732_v0  ;;  %v3698_v32 = vpack.c.bf16 %v4143_v28, %v4135_v21 }
 0x13c   : > { %v3714_v33 = vpack.c.bf16 %v4145_v31, %v4137_v23 }
 0x13d   : > { %3523 = vmatmul.mubr.msk.f32.gmra.mrb[46].mxu0 %vm968_vm2, %v5163_v29  ;;  %3699 = vmatprep.subr.bf16.mxu0 %v3698_v32 }
 0x13e   : > { %3531 = vmatmul.mubr.msk.f32.gmra.mrb[46].mxu1 %vm968_vm2, %v5163_v29  ;;  %3715 = vmatprep.subr.bf16.mxu1 %v3714_v33 }
 0x13f   : > { %3701 = vmatpush1.bf16.msra.mxu0 %v3700_v11  ;;  %3717 = vmatpush1.bf16.msra.mxu1 %v3716_v30 }
 0x140   : > { %1283 = vmatprep.mubr.f32.mxu0 %v4732_v0  ;;  %1396 = vmatprep.mubr.f32.mxu1 %v4732_v0 }
 0x142   : > { %3532 = vmatmul.mubr.msk.f32.vlgmr.msra.gmra.mrb[48].mxu0 %vm968_vm2, %v5064_v10  ;;  %3540 = vmatmul.mubr.msk.f32.vlgmr.msra.gmra.mrb[48].mxu1 %vm968_vm2, %v5064_v10 }
 0x143   : > { %1289 = vmatprep.mubr.f32.mxu0 %v4732_v0  ;;  %1402 = vmatprep.mubr.f32.mxu1 %v4732_v0 }
 0x146   : > { %3533 = vmatmul.mubr.msk.f32.gmra.mrb[50].mxu0 %vm968_vm2, %v5079_v24  ;;  %3541 = vmatmul.mubr.msk.f32.gmra.mrb[50].mxu1 %vm968_vm2, %v5079_v24 }
 0x147   : > { %1295 = vmatprep.mubr.f32.mxu0 %v4732_v0  ;;  %1408 = vmatprep.mubr.f32.mxu1 %v4732_v0 }
 0x14a   : > { %3534 = vmatmul.mubr.msk.f32.gmra.mrb[52].mxu0 %vm968_vm2, %v5097_v40  ;;  %3542 = vmatmul.mubr.msk.f32.gmra.mrb[52].mxu1 %vm968_vm2, %v5097_v40 }
 0x14b   : > { %1301 = vmatprep.mubr.f32.mxu0 %v4732_v0  ;;  %1414 = vmatprep.mubr.f32.mxu1 %v4732_v0 }
 0x14e   : > { %3535 = vmatmul.mubr.msk.f32.gmra.mrb[54].mxu0 %vm968_vm2, %v5114_v55  ;;  %3543 = vmatmul.mubr.msk.f32.gmra.mrb[54].mxu1 %vm968_vm2, %v5114_v55 }
 0x14f   : > { %1307 = vmatprep.mubr.f32.mxu0 %v4732_v0  ;;  %1420 = vmatprep.mubr.f32.mxu1 %v4732_v0 }
 0x152   : > { %3536 = vmatmul.mubr.msk.f32.gmra.mrb[56].mxu0 %vm968_vm2, %v5129_v8  ;;  %3544 = vmatmul.mubr.msk.f32.gmra.mrb[56].mxu1 %vm968_vm2, %v5129_v8 }
 0x153   : > { %1313 = vmatprep.mubr.f32.mxu0 %v4732_v0  ;;  %1426 = vmatprep.mubr.f32.mxu1 %v4732_v0 }
 0x156   : > { %3537 = vmatmul.mubr.msk.f32.gmra.mrb[58].mxu0 %vm968_vm2, %v5141_v15  ;;  %3545 = vmatmul.mubr.msk.f32.gmra.mrb[58].mxu1 %vm968_vm2, %v5141_v15 }
 0x157   : > { %1319 = vmatprep.mubr.f32.mxu0 %v4732_v0  ;;  %1432 = vmatprep.mubr.f32.mxu1 %v4732_v0 }
 0x15a   : > { %3538 = vmatmul.mubr.msk.f32.gmra.mrb[60].mxu0 %vm968_vm2, %v5151_v22  ;;  %3546 = vmatmul.mubr.msk.f32.gmra.mrb[60].mxu1 %vm968_vm2, %v5151_v22 }
 0x15b   : > { %1325 = vmatprep.mubr.f32.mxu0 %v4732_v0  ;;  %1438 = vmatprep.mubr.f32.mxu1 %v4732_v0 }
 0x15e   : > { %3539 = vmatmul.mubr.msk.f32.gmra.mrb[62].mxu0 %vm968_vm2, %v5163_v29  ;;  %3547 = vmatmul.mubr.msk.f32.gmra.mrb[62].mxu1 %vm968_vm2, %v5163_v29 }
 0x15f   : > { %1573 = vmatprep.mubr.f32.mxu0 %v4732_v0  ;;  %1686 = vmatprep.mubr.f32.mxu1 %v4732_v0 }
 0x1f4   : > { %v1059_v36 = vpop.f32.mrb[32].mxu0 }
 0x1f5   : > { %v1060_v37 = vadd.f32 %v1059_v36, %v5220_v34  ;;  %v1172_v38 = vpop.f32.mrb[32].mxu1  ;;  %v1061_v39 = vpop.f32.mrb[33].mxu0 }
 0x1f6   : > { %v1173_v35 = vadd.f32 %v1172_v38, %v5220_v34  ;;  %v1062_v41 = vadd.f32 %v1061_v39, %v5220_v34  ;;  %v1174_v25 = vpop.f32.mrb[33].mxu1  ;;  %v5250_v36 = vpop.permute.xlu1 %955 }
 0x1f7   : > { %4146 = vtanh.f32 %v1060_v37  ;;  %v1175_v43 = vadd.f32 %v1174_v25, %v5220_v34 }
 0x1f8   : > { %4148 = vtanh.f32 %v1173_v35  ;;  %v1065_v47 = vpop.f32.mrb[34].mxu0 }
 0x1f9   : > { %4150 = vtanh.f32 %v1062_v41  ;;  %v1066_v48 = vadd.f32 %v1065_v47, %v5226_v46  ;;  %v1178_v49 = vpop.f32.mrb[34].mxu1  ;;  %v1067_v50 = vpop.f32.mrb[35].mxu0 }
 0x1fa   : > { %4152 = vtanh.f32 %v1175_v43  ;;  %v1179_v51 = vadd.f32 %v1178_v49, %v5226_v46  ;;  %v1068_v52 = vadd.f32 %v1067_v50, %v5226_v46  ;;  %v1180_v53 = vpop.f32.mrb[35].mxu1 }
 0x1fb   : > { %4154 = vtanh.f32 %v1066_v48  ;;  %v1181_v44 = vadd.f32 %v1180_v53, %v5226_v46 }
 0x1fc   : > { %4156 = vtanh.f32 %v1179_v51  ;;  %v1071_v56 = vpop.f32.mrb[36].mxu0 }
 0x1fd   : > { %4158 = vtanh.f32 %v1068_v52  ;;  %v1072_v42 = vadd.f32 %v1071_v56, %v5232_v54  ;;  %v1184_v57 = vpop.f32.mrb[36].mxu1  ;;  %v1073_v59 = vpop.f32.mrb[37].mxu0 }
 0x1fe   : > { %4160 = vtanh.f32 %v1181_v44  ;;  %v1185_v60 = vadd.f32 %v1184_v57, %v5232_v54  ;;  %v1074_v61 = vadd.f32 %v1073_v59, %v5232_v54  ;;  %v1186_v63 = vpop.f32.mrb[37].mxu1  ;;  %v5256_v44 = vpop.permute.xlu0 %960 }
 0x1ff   : > { %4162 = vtanh.f32 %v1072_v42  ;;  %v1187_v1 = vadd.f32 %v1186_v63, %v5232_v54 }
 0x200   : > { %4164 = vtanh.f32 %v1185_v60  ;;  %v1077_v3 = vpop.f32.mrb[38].mxu0 }
 0x201   : > { %v4147_v4 = vpop.eup %4146  ;;  %4166 = vtanh.f32 %v1074_v61  ;;  %v1078_v5 = vadd.f32 %v1077_v3, %v5238_v2  ;;  %v1190_v6 = vpop.f32.mrb[38].mxu1 }
 0x202   : > { %v1079_v45 = vpop.f32.mrb[39].mxu0  ;;  %v4149_v7 = vpop.eup %4148  ;;  %4168 = vtanh.f32 %v1187_v1  ;;  %v1191_v9 = vadd.f32 %v1190_v6, %v5238_v2 }
 0x203   : > { %v1080_v58 = vadd.f32 %v1079_v45, %v5238_v2  ;;  %v1192_v12 = vpop.f32.mrb[39].mxu1  ;;  %v4151_v13 = vpop.eup %4150  ;;  %4170 = vtanh.f32 %v1078_v5 }
 0x204   : > { %v1193_v14 = vadd.f32 %v1192_v12, %v5238_v2  ;;  %v4153_v62 = vpop.eup %4152  ;;  %4172 = vtanh.f32 %v1191_v9  ;;  %v1083_v17 = vpop.f32.mrb[40].mxu0 }
 0x205   : > { %v4155_v18 = vpop.eup %4154  ;;  %4174 = vtanh.f32 %v1080_v58  ;;  %v1084_v19 = vadd.f32 %v1083_v17, %v5244_v16  ;;  %v1196_v20 = vpop.f32.mrb[40].mxu1 }
 0x206   : > { %v1085_v21 = vpop.f32.mrb[41].mxu0  ;;  %v4157_v23 = vpop.eup %4156  ;;  %4176 = vtanh.f32 %v1193_v14  ;;  %v1197_v26 = vadd.f32 %v1196_v20, %v5244_v16  ;;  %v3720_v28 = vpack.c.bf16 %v4155_v18, %v4147_v4 }
 0x207   : > { %v1086_v27 = vadd.f32 %v1085_v21, %v5244_v16  ;;  %v1198_v11 = vpop.f32.mrb[41].mxu1  ;;  %v4159_v30 = vpop.eup %4158  ;;  %4178 = vtanh.f32 %v1084_v19  ;;  %v3736_v32 = vpack.c.bf16 %v4157_v23, %v4149_v7 }
 0x208   : > { %v1199_v31 = vadd.f32 %v1198_v11, %v5244_v16  ;;  %v4161_v33 = vpop.eup %4160  ;;  %4180 = vtanh.f32 %v1197_v26  ;;  %v1089_v37 = vpop.f32.mrb[42].mxu0  ;;  %v3718_v38 = vpack.c.bf16 %v4159_v30, %v4151_v13 }
 0x209   : > { %v4163_v39 = vpop.eup %4162  ;;  %4182 = vtanh.f32 %v1086_v27  ;;  %v1090_v35 = vadd.f32 %v1089_v37, %v5250_v36  ;;  %v1202_v41 = vpop.f32.mrb[42].mxu1  ;;  %v3734_v43 = vpack.c.bf16 %v4161_v33, %v4153_v62 }
 0x20a   : > { %v1091_v25 = vpop.f32.mrb[43].mxu0  ;;  %v4165_v47 = vpop.eup %4164  ;;  %4184 = vtanh.f32 %v1199_v31  ;;  %v1203_v48 = vadd.f32 %v1202_v41, %v5250_v36  ;;  %3719 = vmatprep.subr.bf16.mxu0 %v3718_v38 }
 0x20b   : > { %v1092_v49 = vadd.f32 %v1091_v25, %v5250_v36  ;;  %v1204_v50 = vpop.f32.mrb[43].mxu1  ;;  %v4167_v51 = vpop.eup %4166  ;;  %4186 = vtanh.f32 %v1090_v35  ;;  %3735 = vmatprep.subr.bf16.mxu1 %v3734_v43  ;;  %3721 = vmatpush1.bf16.msra.mxu0 %v3720_v28 }
 0x20c   : > { %v1205_v52 = vadd.f32 %v1204_v50, %v5250_v36  ;;  %v4169_v53 = vpop.eup %4168  ;;  %4188 = vtanh.f32 %v1203_v48  ;;  %3737 = vmatpush1.bf16.msra.mxu1 %v3736_v32  ;;  %v1095_v56 = vpop.f32.mrb[44].mxu0 }
 0x20d   : > { %v4171_v42 = vpop.eup %4170  ;;  %4190 = vtanh.f32 %v1092_v49  ;;  %v1096_v57 = vadd.f32 %v1095_v56, %v5256_v44  ;;  %v1208_v59 = vpop.f32.mrb[44].mxu1 }
 0x20e   : > { %v1097_v60 = vpop.f32.mrb[45].mxu0  ;;  %v4173_v61 = vpop.eup %4172  ;;  %4192 = vtanh.f32 %v1205_v52  ;;  %v1209_v63 = vadd.f32 %v1208_v59, %v5256_v44  ;;  %v3724_v4 = vpack.c.bf16 %v4171_v42, %v4163_v39 }
 0x20f   : > { %v1098_v1 = vadd.f32 %v1097_v60, %v5256_v44  ;;  %v1210_v3 = vpop.f32.mrb[45].mxu1  ;;  %v4175_v5 = vpop.eup %4174  ;;  %4194 = vtanh.f32 %v1096_v57  ;;  %v3740_v45 = vpack.c.bf16 %v4173_v61, %v4165_v47 }
 0x210   : > { %v1211_v6 = vadd.f32 %v1210_v3, %v5256_v44  ;;  %v4177_v7 = vpop.eup %4176  ;;  %v5262_v9 = vpop.permute.xlu1 %965  ;;  %4196 = vtanh.f32 %v1209_v63  ;;  %v3722_v12 = vpack.c.bf16 %v4175_v5, %v4167_v51 }
 0x211   : > { %v1101_v58 = vpop.f32.mrb[46].mxu0  ;;  %v4179_v13 = vpop.eup %4178  ;;  %4198 = vtanh.f32 %v1098_v1  ;;  %v3738_v18 = vpack.c.bf16 %v4177_v7, %v4169_v53 }
 0x212   : > { %v1102_v14 = vadd.f32 %v1101_v58, %v5262_v9  ;;  %v1214_v62 = vpop.f32.mrb[46].mxu1  ;;  %v1103_v17 = vpop.f32.mrb[47].mxu0  ;;  %4200 = vtanh.f32 %v1211_v6  ;;  %3723 = vmatprep.subr.bf16.mxu0 %v3722_v12 }
 0x213   : > { %v4181_v19 = vpop.eup %4180  ;;  %v1215_v20 = vadd.f32 %v1214_v62, %v5262_v9  ;;  %v1104_v21 = vadd.f32 %v1103_v17, %v5262_v9  ;;  %v1216_v23 = vpop.f32.mrb[47].mxu1  ;;  %3739 = vmatprep.subr.bf16.mxu1 %v3738_v18  ;;  %3725 = vmatpush1.bf16.msra.mxu0 %v3724_v4 }
 0x214   : > { %v4183_v26 = vpop.eup %4182  ;;  %4202 = vtanh.f32 %v1102_v14  ;;  %v1217_v27 = vadd.f32 %v1216_v23, %v5262_v9  ;;  %3741 = vmatpush1.bf16.msra.mxu1 %v3740_v45 }
 0x215   : > { %v4185_v11 = vpop.eup %4184  ;;  %4204 = vtanh.f32 %v1215_v20  ;;  %v1285_v30 = vpop.f32.mrb[48].mxu0 }
 0x216   : > { %v4187_v28 = vpop.eup %4186  ;;  %4206 = vtanh.f32 %v1104_v21  ;;  %v1398_v31 = vpop.f32.mrb[48].mxu1  ;;  %v1286_v33 = vadd.f32 %v1285_v30, %v5220_v34 }
 0x217   : > { %v4189_v32 = vpop.eup %4188  ;;  %4208 = vtanh.f32 %v1217_v27  ;;  %v1399_v37 = vadd.f32 %v1398_v31, %v5220_v34  ;;  %v1287_v38 = vpop.f32.mrb[49].mxu0  ;;  %v3728_v35 = vpack.c.bf16 %v4187_v28, %v4179_v13 }
 0x218   : > { %v1400_v39 = vpop.f32.mrb[49].mxu1  ;;  %v4191_v41 = vpop.eup %4190  ;;  %v1288_v25 = vadd.f32 %v1287_v38, %v5220_v34  ;;  %v3744_v47 = vpack.c.bf16 %v4189_v32, %v4181_v19  ;;  %4210 = vtanh.f32 %v1286_v33 }
 0x219   : > { %v1401_v43 = vadd.f32 %v1400_v39, %v5220_v34  ;;  %v4193_v48 = vpop.eup %4192  ;;  %v3726_v49 = vpack.c.bf16 %v4191_v41, %v4183_v26  ;;  %4212 = vtanh.f32 %v1399_v37  ;;  %v1291_v51 = vpop.f32.mrb[50].mxu0 }
 0x21a   : > { %v4195_v50 = vpop.eup %4194  ;;  %v1404_v52 = vpop.f32.mrb[50].mxu1  ;;  %v3742_v53 = vpack.c.bf16 %v4193_v48, %v4185_v11  ;;  %4214 = vtanh.f32 %v1288_v25  ;;  %v1292_v42 = vadd.f32 %v1291_v51, %v5226_v46 }
 0x21b   : > { %v4197_v56 = vpop.eup %4196  ;;  %v1405_v57 = vadd.f32 %v1404_v52, %v5226_v46  ;;  %v1293_v59 = vpop.f32.mrb[51].mxu0  ;;  %3727 = vmatprep.subr.bf16.mxu0 %v3726_v49  ;;  %4216 = vtanh.f32 %v1401_v43 }
 0x21c   : > { %v1406_v60 = vpop.f32.mrb[51].mxu1  ;;  %v4199_v61 = vpop.eup %4198  ;;  %v1294_v63 = vadd.f32 %v1293_v59, %v5226_v46  ;;  %3743 = vmatprep.subr.bf16.mxu1 %v3742_v53  ;;  %3729 = vmatpush1.bf16.msra.mxu0 %v3728_v35  ;;  %4218 = vtanh.f32 %v1292_v42 }
 0x21d   : > { %v1407_v1 = vadd.f32 %v1406_v60, %v5226_v46  ;;  %v4201_v3 = vpop.eup %4200  ;;  %3745 = vmatpush1.bf16.msra.mxu1 %v3744_v47  ;;  %4220 = vtanh.f32 %v1405_v57  ;;  %v1297_v5 = vpop.f32.mrb[52].mxu0 }
 0x21e   : > { %v4203_v4 = vpop.eup %4202  ;;  %v1410_v6 = vpop.f32.mrb[52].mxu1  ;;  %4222 = vtanh.f32 %v1294_v63  ;;  %v1298_v7 = vadd.f32 %v1297_v5, %v5232_v54 }
 0x21f   : > { %v4205_v45 = vpop.eup %4204  ;;  %v1411_v58 = vadd.f32 %v1410_v6, %v5232_v54  ;;  %v1299_v12 = vpop.f32.mrb[53].mxu0  ;;  %v3732_v14 = vpack.c.bf16 %v4203_v4, %v4195_v50  ;;  %4224 = vtanh.f32 %v1407_v1 }
 0x220   : > { %v1412_v13 = vpop.f32.mrb[53].mxu1  ;;  %v4207_v62 = vpop.eup %4206  ;;  %v1300_v17 = vadd.f32 %v1299_v12, %v5232_v54  ;;  %v3748_v19 = vpack.c.bf16 %v4205_v45, %v4197_v56  ;;  %4226 = vtanh.f32 %v1298_v7 }
 0x221   : > { %v1413_v18 = vadd.f32 %v1412_v13, %v5232_v54  ;;  %v4209_v20 = vpop.eup %4208  ;;  %v3730_v21 = vpack.c.bf16 %v4207_v62, %v4199_v61  ;;  %4228 = vtanh.f32 %v1411_v58  ;;  %v1303_v23 = vpop.f32.mrb[54].mxu0 }
 0x222   : > { %v1416_v26 = vpop.f32.mrb[54].mxu1  ;;  %v3746_v27 = vpack.c.bf16 %v4209_v20, %v4201_v3  ;;  %v4211_v11 = vpop.eup %4210  ;;  %4230 = vtanh.f32 %v1300_v17  ;;  %v1304_v28 = vadd.f32 %v1303_v23, %v5238_v2 }
 0x223   : > { %v1417_v30 = vadd.f32 %v1416_v26, %v5238_v2  ;;  %v1305_v31 = vpop.f32.mrb[55].mxu0  ;;  %v1418_v32 = vpop.f32.mrb[55].mxu1  ;;  %3731 = vmatprep.subr.bf16.mxu0 %v3730_v21  ;;  %4232 = vtanh.f32 %v1413_v18 }
 0x224   : > { %v4213_v33 = vpop.eup %4212  ;;  %v1306_v37 = vadd.f32 %v1305_v31, %v5238_v2  ;;  %v1419_v38 = vadd.f32 %v1418_v32, %v5238_v2  ;;  %3747 = vmatprep.subr.bf16.mxu1 %v3746_v27  ;;  %3733 = vmatpush1.bf16.msra.mxu0 %v3732_v14  ;;  %4234 = vtanh.f32 %v1304_v28 }
 0x225   : > { %v4215_v39 = vpop.eup %4214  ;;  %3749 = vmatpush1.bf16.msra.mxu1 %v3748_v19  ;;  %4236 = vtanh.f32 %v1417_v30  ;;  %v1309_v41 = vpop.f32.mrb[56].mxu0 }
 0x226   : > { %v4217_v35 = vpop.eup %4216  ;;  %v1422_v25 = vpop.f32.mrb[56].mxu1  ;;  %4238 = vtanh.f32 %v1306_v37  ;;  %v1310_v47 = vadd.f32 %v1309_v41, %v5244_v16 }
 0x227   : > { %v4219_v43 = vpop.eup %4218  ;;  %v1423_v48 = vadd.f32 %v1422_v25, %v5244_v16  ;;  %v1311_v49 = vpop.f32.mrb[57].mxu0  ;;  %3548 = vmatmul.mubr.msk.f32.vlgmr.msra.gmra.mrb[64].mxu0 %vm968_vm2, %v5064_v10  ;;  %4240 = vtanh.f32 %v1419_v38 }
 0x228   : > { %v1424_v50 = vpop.f32.mrb[57].mxu1  ;;  %v4221_v51 = vpop.eup %4220  ;;  %v1312_v52 = vadd.f32 %v1311_v49, %v5244_v16  ;;  %3556 = vmatmul.mubr.msk.f32.vlgmr.msra.gmra.mrb[64].mxu1 %vm968_vm2, %v5064_v10  ;;  %1579 = vmatprep.mubr.f32.mxu0 %v4732_v0  ;;  %v3752_v56 = vpack.c.bf16 %v4219_v43, %v4211_v11  ;;  %4242 = vtanh.f32 %v1310_v47 }
 0x229   : > { %v1425_v53 = vadd.f32 %v1424_v50, %v5244_v16  ;;  %v4223_v42 = vpop.eup %4222  ;;  %1692 = vmatprep.mubr.f32.mxu1 %v4732_v0  ;;  %v3768_v57 = vpack.c.bf16 %v4221_v51, %v4213_v33  ;;  %4244 = vtanh.f32 %v1423_v48  ;;  %v1315_v60 = vpop.f32.mrb[58].mxu0 }
 0x22a   : > { %v4225_v59 = vpop.eup %4224  ;;  %v1428_v61 = vpop.f32.mrb[58].mxu1  ;;  %v3750_v63 = vpack.c.bf16 %v4223_v42, %v4215_v39  ;;  %4246 = vtanh.f32 %v1312_v52  ;;  %v1316_v3 = vadd.f32 %v1315_v60, %v5250_v36 }
 0x22b   : > { %v5294_v1 = vpop.eup %4226  ;;  %v1429_v10 = vadd.f32 %v1428_v61, %v5250_v36  ;;  %v1317_v4 = vpop.f32.mrb[59].mxu0  ;;  %3549 = vmatmul.mubr.msk.f32.gmra.mrb[66].mxu0 %vm968_vm2, %v5079_v24  ;;  %v3766_v6 = vpack.c.bf16 %v4225_v59, %v4217_v35  ;;  %4248 = vtanh.f32 %v1425_v53 }
 0x22c   : > { %v1430_v5 = vpop.f32.mrb[59].mxu1  ;;  %v4229_v45 = vpop.eup %4228  ;;  %v1318_v7 = vadd.f32 %v1317_v4, %v5250_v36  ;;  %3557 = vmatmul.mubr.msk.f32.gmra.mrb[66].mxu1 %vm968_vm2, %v5079_v24  ;;  %3751 = vmatprep.subr.bf16.mxu0 %v3750_v63  ;;  %4250 = vtanh.f32 %v1316_v3 }
 0x22d   : > { %v1431_v58 = vadd.f32 %v1430_v5, %v5250_v36  ;;  %v4231_v12 = vpop.eup %4230  ;;  %3767 = vmatprep.subr.bf16.mxu1 %v3766_v6  ;;  %3753 = vmatpush1.bf16.msra.mxu0 %v3752_v56  ;;  %4252 = vtanh.f32 %v1429_v10  ;;  %v1321_v14 = vpop.f32.mrb[60].mxu0 }
 0x22e   : > { %v4233_v13 = vpop.eup %4232  ;;  %3769 = vmatpush1.bf16.msra.mxu1 %v3768_v57  ;;  %v1434_v62 = vpop.f32.mrb[60].mxu1  ;;  %1585 = vmatprep.mubr.f32.mxu0 %v4732_v0  ;;  %4254 = vtanh.f32 %v1318_v7  ;;  %v1322_v18 = vadd.f32 %v1321_v14, %v5256_v44  ;;  %v5365_v14 = vld [vmem:[%s5910_s3 + $0x8] sm:$0xff] }
 0x22f   : > { %v4235_v17 = vpop.eup %4234  ;;  %v1435_v19 = vadd.f32 %v1434_v62, %v5256_v44  ;;  %1698 = vmatprep.mubr.f32.mxu1 %v4732_v0  ;;  %v1323_v24 = vpop.f32.mrb[61].mxu0  ;;  %3550 = vmatmul.mubr.msk.f32.gmra.mrb[68].mxu0 %vm968_vm2, %v5097_v40  ;;  %4256 = vtanh.f32 %v1431_v58 }
 0x230   : > { %v1436_v20 = vpop.f32.mrb[61].mxu1  ;;  %v4237_v21 = vpop.eup %4236  ;;  %v1324_v23 = vadd.f32 %v1323_v24, %v5256_v44  ;;  %3558 = vmatmul.mubr.msk.f32.gmra.mrb[68].mxu1 %vm968_vm2, %v5097_v40  ;;  %1591 = vmatprep.mubr.f32.mxu0 %v4732_v0  ;;  %v3756_v27 = vpack.c.bf16 %v4235_v17, %v5294_v1  ;;  %4258 = vtanh.f32 %v1322_v18 }
 0x231   : > { %v1437_v26 = vadd.f32 %v1436_v20, %v5256_v44  ;;  %v4239_v11 = vpop.eup %4238  ;;  %1704 = vmatprep.mubr.f32.mxu1 %v4732_v0  ;;  %v3772_v28 = vpack.c.bf16 %v4237_v21, %v4229_v45  ;;  %4260 = vtanh.f32 %v1435_v19  ;;  %v1327_v31 = vpop.f32.mrb[62].mxu0 }
 0x232   : > { %v4241_v30 = vpop.eup %4240  ;;  %v1440_v32 = vpop.f32.mrb[62].mxu1  ;;  %v3754_v33 = vpack.c.bf16 %v4239_v11, %v4231_v12  ;;  %4262 = vtanh.f32 %v1324_v23  ;;  %v1328_v38 = vadd.f32 %v1327_v31, %v5262_v9 }
 0x233   : > { %v4243_v37 = vpop.eup %4242  ;;  %v1441_v39 = vadd.f32 %v1440_v32, %v5262_v9  ;;  %v1329_v35 = vpop.f32.mrb[63].mxu0  ;;  %3551 = vmatmul.mubr.msk.f32.gmra.mrb[70].mxu0 %vm968_vm2, %v5114_v55  ;;  %v3770_v25 = vpack.c.bf16 %v4241_v30, %v4233_v13  ;;  %4264 = vtanh.f32 %v1437_v26  ;;  %v5354_v13 = vld [vmem:[%s5910_s3] sm:$0xff] }
 0x234   : > { %v1442_v41 = vpop.f32.mrb[63].mxu1  ;;  %v4245_v43 = vpop.eup %4244  ;;  %v1330_v47 = vadd.f32 %v1329_v35, %v5262_v9  ;;  %3559 = vmatmul.mubr.msk.f32.gmra.mrb[70].mxu1 %vm968_vm2, %v5114_v55  ;;  %3755 = vmatprep.subr.bf16.mxu0 %v3754_v33  ;;  %4266 = vtanh.f32 %v1328_v38 }
 0x235   : > { %v1443_v48 = vadd.f32 %v1442_v41, %v5262_v9  ;;  %v4247_v49 = vpop.eup %4246  ;;  %3771 = vmatprep.subr.bf16.mxu1 %v3770_v25  ;;  %3757 = vmatpush1.bf16.msra.mxu0 %v3756_v27  ;;  %4268 = vtanh.f32 %v1441_v39 }
 0x236   : > { %v4249_v50 = vpop.eup %4248  ;;  %3773 = vmatpush1.bf16.msra.mxu1 %v3772_v28  ;;  %1597 = vmatprep.mubr.f32.mxu0 %v4732_v0  ;;  %4270 = vtanh.f32 %v1330_v47 }
 0x237   : > { %v4251_v51 = vpop.eup %4250  ;;  %1710 = vmatprep.mubr.f32.mxu1 %v4732_v0  ;;  %3552 = vmatmul.mubr.msk.f32.gmra.mrb[72].mxu0 %vm968_vm2, %v5129_v8  ;;  %4272 = vtanh.f32 %v1443_v48 }
 0x238   : > { %v4253_v52 = vpop.eup %4252  ;;  %3560 = vmatmul.mubr.msk.f32.gmra.mrb[72].mxu1 %vm968_vm2, %v5129_v8  ;;  %1603 = vmatprep.mubr.f32.mxu0 %v4732_v0  ;;  %v3760_v53 = vpack.c.bf16 %v4251_v51, %v4243_v37 }
 0x239   : > { %v4255_v56 = vpop.eup %4254  ;;  %1716 = vmatprep.mubr.f32.mxu1 %v4732_v0  ;;  %v3776_v42 = vpack.c.bf16 %v4253_v52, %v4245_v43 }
 0x23a   : > { %v4257_v57 = vpop.eup %4256  ;;  %v3758_v59 = vpack.c.bf16 %v4255_v56, %v4247_v49 }
 0x23b   : > { %v4259_v60 = vpop.eup %4258  ;;  %3553 = vmatmul.mubr.msk.f32.gmra.mrb[74].mxu0 %vm968_vm2, %v5141_v15  ;;  %v3774_v61 = vpack.c.bf16 %v4257_v57, %v4249_v50 }
 0x23c   : > { %v4261_v63 = vpop.eup %4260  ;;  %3561 = vmatmul.mubr.msk.f32.gmra.mrb[74].mxu1 %vm968_vm2, %v5141_v15  ;;  %3759 = vmatprep.subr.bf16.mxu0 %v3758_v59 }
 0x23d   : > { %v4263_v1 = vpop.eup %4262  ;;  %3775 = vmatprep.subr.bf16.mxu1 %v3774_v61  ;;  %3761 = vmatpush1.bf16.msra.mxu0 %v3760_v53 }
 0x23e   : > { %v4265_v3 = vpop.eup %4264  ;;  %3777 = vmatpush1.bf16.msra.mxu1 %v3776_v42  ;;  %1609 = vmatprep.mubr.f32.mxu0 %v4732_v0 }
 0x23f   : > { %v4267_v10 = vpop.eup %4266  ;;  %1722 = vmatprep.mubr.f32.mxu1 %v4732_v0  ;;  %3554 = vmatmul.mubr.msk.f32.gmra.mrb[76].mxu0 %vm968_vm2, %v5151_v22 }
 0x240   : > { %v4269_v4 = vpop.eup %4268  ;;  %3562 = vmatmul.mubr.msk.f32.gmra.mrb[76].mxu1 %vm968_vm2, %v5151_v22  ;;  %1615 = vmatprep.mubr.f32.mxu0 %v4732_v0  ;;  %v3764_v5 = vpack.c.bf16 %v4267_v10, %v4259_v60 }
 0x241   : > { %v4271_v6 = vpop.eup %4270  ;;  %1728 = vmatprep.mubr.f32.mxu1 %v4732_v0  ;;  %v3780_v45 = vpack.c.bf16 %v4269_v4, %v4261_v63 }
 0x242   : > { %v4273_v7 = vpop.eup %4272  ;;  %v3762_v58 = vpack.c.bf16 %v4271_v6, %v4263_v1 }
 0x243   : > { %3555 = vmatmul.mubr.msk.f32.gmra.mrb[78].mxu0 %vm968_vm2, %v5163_v29  ;;  %v3778_v12 = vpack.c.bf16 %v4273_v7, %v4265_v3 }
 0x244   : > { %3563 = vmatmul.mubr.msk.f32.gmra.mrb[78].mxu1 %vm968_vm2, %v5163_v29  ;;  %3763 = vmatprep.subr.bf16.mxu0 %v3762_v58 }
 0x245   : > { %3779 = vmatprep.subr.bf16.mxu1 %v3778_v12  ;;  %3765 = vmatpush1.bf16.msra.mxu0 %v3764_v5 }
 0x246   : > { %3781 = vmatpush1.bf16.msra.mxu1 %v3780_v45  ;;  %1799 = vmatprep.mubr.f32.mxu0 %v4732_v0 }
 0x247   : > { %1912 = vmatprep.mubr.f32.mxu1 %v4732_v0 }
 0x248   : > { %3564 = vmatmul.mubr.msk.f32.vlgmr.msra.gmra.mrb[80].mxu0 %vm968_vm2, %v5354_v13 }
 0x249   : > { %3572 = vmatmul.mubr.msk.f32.vlgmr.msra.gmra.mrb[80].mxu1 %vm968_vm2, %v5354_v13  ;;  %1805 = vmatprep.mubr.f32.mxu0 %v4732_v0 }
 0x24a   : > { %1918 = vmatprep.mubr.f32.mxu1 %v4732_v0 }
 0x24c   : > { %3565 = vmatmul.mubr.msk.f32.gmra.mrb[82].mxu0 %vm968_vm2, %v5365_v14 }
 0x24d   : > { %3573 = vmatmul.mubr.msk.f32.gmra.mrb[82].mxu1 %vm968_vm2, %v5365_v14  ;;  %1811 = vmatprep.mubr.f32.mxu0 %v4732_v0 }
 0x24e   : > { %1924 = vmatprep.mubr.f32.mxu1 %v4732_v0 }
 0x250   : > { %3566 = vmatmul.mubr.msk.f32.gmra.mrb[84].mxu0 %vm968_vm2, %v5097_v40 }
 0x251   : > { %3574 = vmatmul.mubr.msk.f32.gmra.mrb[84].mxu1 %vm968_vm2, %v5097_v40  ;;  %1817 = vmatprep.mubr.f32.mxu0 %v4732_v0 }
 0x252   : > { %1930 = vmatprep.mubr.f32.mxu1 %v4732_v0 }
 0x254   : > { %3567 = vmatmul.mubr.msk.f32.gmra.mrb[86].mxu0 %vm968_vm2, %v5114_v55 }
 0x255   : > { %3575 = vmatmul.mubr.msk.f32.gmra.mrb[86].mxu1 %vm968_vm2, %v5114_v55  ;;  %1823 = vmatprep.mubr.f32.mxu0 %v4732_v0 }
 0x256   : > { %1936 = vmatprep.mubr.f32.mxu1 %v4732_v0 }
 0x258   : > { %3568 = vmatmul.mubr.msk.f32.gmra.mrb[88].mxu0 %vm968_vm2, %v5129_v8 }
 0x259   : > { %3576 = vmatmul.mubr.msk.f32.gmra.mrb[88].mxu1 %vm968_vm2, %v5129_v8  ;;  %1829 = vmatprep.mubr.f32.mxu0 %v4732_v0 }
 0x25a   : > { %1942 = vmatprep.mubr.f32.mxu1 %v4732_v0 }
 0x25c   : > { %3569 = vmatmul.mubr.msk.f32.gmra.mrb[90].mxu0 %vm968_vm2, %v5141_v15 }
 0x25d   : > { %3577 = vmatmul.mubr.msk.f32.gmra.mrb[90].mxu1 %vm968_vm2, %v5141_v15  ;;  %1835 = vmatprep.mubr.f32.mxu0 %v4732_v0 }
 0x25e   : > { %1948 = vmatprep.mubr.f32.mxu1 %v4732_v0 }
 0x260   : > { %3570 = vmatmul.mubr.msk.f32.gmra.mrb[92].mxu0 %vm968_vm2, %v5151_v22 }
 0x261   : > { %3578 = vmatmul.mubr.msk.f32.gmra.mrb[92].mxu1 %vm968_vm2, %v5151_v22  ;;  %1841 = vmatprep.mubr.f32.mxu0 %v4732_v0 }
 0x262   : > { %1954 = vmatprep.mubr.f32.mxu1 %v4732_v0 }
 0x264   : > { %3571 = vmatmul.mubr.msk.f32.gmra.mrb[94].mxu0 %vm968_vm2, %v5163_v29 }
 0x265   : > { %3579 = vmatmul.mubr.msk.f32.gmra.mrb[94].mxu1 %vm968_vm2, %v5163_v29  ;;  %2089 = vmatprep.mubr.f32.mxu0 %v4732_v0 }
 0x266   : > { %2202 = vmatprep.mubr.f32.mxu1 %v4732_v0 }
 0x2fa   : > { %v1575_v40 = vpop.f32.mrb[64].mxu0 }
 0x2fb   : > { %v1576_v55 = vadd.f32 %v1575_v40, %v5220_v34  ;;  %v1688_v8 = vpop.f32.mrb[64].mxu1  ;;  %v1577_v15 = vpop.f32.mrb[65].mxu0 }
 0x2fc   : > { %v1689_v22 = vadd.f32 %v1688_v8, %v5220_v34  ;;  %v1578_v62 = vadd.f32 %v1577_v15, %v5220_v34  ;;  %v1690_v17 = vpop.f32.mrb[65].mxu1 }
 0x2fd   : > { %4274 = vtanh.f32 %v1576_v55  ;;  %v1691_v18 = vadd.f32 %v1690_v17, %v5220_v34 }
 0x2fe   : > { %4276 = vtanh.f32 %v1689_v22  ;;  %v1581_v19 = vpop.f32.mrb[66].mxu0 }
 0x2ff   : > { %4278 = vtanh.f32 %v1578_v62  ;;  %v1582_v29 = vadd.f32 %v1581_v19, %v5226_v46  ;;  %v1694_v24 = vpop.f32.mrb[66].mxu1  ;;  %v1583_v20 = vpop.f32.mrb[67].mxu0 }
 0x300   : > { %4280 = vtanh.f32 %v1691_v18  ;;  %v1695_v21 = vadd.f32 %v1694_v24, %v5226_v46  ;;  %v1584_v23 = vadd.f32 %v1583_v20, %v5226_v46  ;;  %v1696_v26 = vpop.f32.mrb[67].mxu1 }
 0x301   : > { %4282 = vtanh.f32 %v1582_v29  ;;  %v1697_v27 = vadd.f32 %v1696_v26, %v5226_v46 }
 0x302   : > { %4284 = vtanh.f32 %v1695_v21  ;;  %v1587_v11 = vpop.f32.mrb[68].mxu0 }
 0x303   : > { %4286 = vtanh.f32 %v1584_v23  ;;  %v1588_v28 = vadd.f32 %v1587_v11, %v5232_v54  ;;  %v1700_v30 = vpop.f32.mrb[68].mxu1  ;;  %v1589_v31 = vpop.f32.mrb[69].mxu0 }
 0x304   : > { %4288 = vtanh.f32 %v1697_v27  ;;  %v1701_v32 = vadd.f32 %v1700_v30, %v5232_v54  ;;  %v1590_v33 = vadd.f32 %v1589_v31, %v5232_v54  ;;  %v1702_v37 = vpop.f32.mrb[69].mxu1 }
 0x305   : > { %4290 = vtanh.f32 %v1588_v28  ;;  %v1703_v38 = vadd.f32 %v1702_v37, %v5232_v54 }
 0x306   : > { %4292 = vtanh.f32 %v1701_v32  ;;  %v1593_v39 = vpop.f32.mrb[70].mxu0 }
 0x307   : > { %v4275_v35 = vpop.eup %4274  ;;  %4294 = vtanh.f32 %v1590_v33  ;;  %v1594_v41 = vadd.f32 %v1593_v39, %v5238_v2  ;;  %v1706_v25 = vpop.f32.mrb[70].mxu1 }
 0x308   : > { %v1595_v43 = vpop.f32.mrb[71].mxu0  ;;  %v4277_v47 = vpop.eup %4276  ;;  %4296 = vtanh.f32 %v1703_v38  ;;  %v1707_v48 = vadd.f32 %v1706_v25, %v5238_v2 }
 0x309   : > { %v1596_v49 = vadd.f32 %v1595_v43, %v5238_v2  ;;  %v1708_v50 = vpop.f32.mrb[71].mxu1  ;;  %v4279_v51 = vpop.eup %4278  ;;  %4298 = vtanh.f32 %v1594_v41 }
 0x30a   : > { %v1709_v52 = vadd.f32 %v1708_v50, %v5238_v2  ;;  %v4281_v53 = vpop.eup %4280  ;;  %4300 = vtanh.f32 %v1707_v48  ;;  %v1599_v56 = vpop.f32.mrb[72].mxu0 }
 0x30b   : > { %v4283_v42 = vpop.eup %4282  ;;  %4302 = vtanh.f32 %v1596_v49  ;;  %v1600_v57 = vadd.f32 %v1599_v56, %v5244_v16  ;;  %v1712_v59 = vpop.f32.mrb[72].mxu1 }
 0x30c   : > { %v1601_v60 = vpop.f32.mrb[73].mxu0  ;;  %v4285_v61 = vpop.eup %4284  ;;  %4304 = vtanh.f32 %v1709_v52  ;;  %v1713_v63 = vadd.f32 %v1712_v59, %v5244_v16  ;;  %v3784_v10 = vpack.c.bf16 %v4283_v42, %v4275_v35 }
 0x30d   : > { %v1602_v1 = vadd.f32 %v1601_v60, %v5244_v16  ;;  %v1714_v3 = vpop.f32.mrb[73].mxu1  ;;  %v4287_v4 = vpop.eup %4286  ;;  %4306 = vtanh.f32 %v1600_v57  ;;  %v3800_v6 = vpack.c.bf16 %v4285_v61, %v4277_v47 }
 0x30e   : > { %v1715_v5 = vadd.f32 %v1714_v3, %v5244_v16  ;;  %v4289_v45 = vpop.eup %4288  ;;  %4308 = vtanh.f32 %v1713_v63  ;;  %v1605_v7 = vpop.f32.mrb[74].mxu0  ;;  %v3782_v58 = vpack.c.bf16 %v4287_v4, %v4279_v51 }
 0x30f   : > { %v4291_v12 = vpop.eup %4290  ;;  %4310 = vtanh.f32 %v1602_v1  ;;  %v1606_v40 = vadd.f32 %v1605_v7, %v5250_v36  ;;  %v1718_v55 = vpop.f32.mrb[74].mxu1  ;;  %v3798_v15 = vpack.c.bf16 %v4289_v45, %v4281_v53 }
 0x310   : > { %v1607_v8 = vpop.f32.mrb[75].mxu0  ;;  %v4293_v22 = vpop.eup %4292  ;;  %4312 = vtanh.f32 %v1715_v5  ;;  %v1719_v62 = vadd.f32 %v1718_v55, %v5250_v36  ;;  %3783 = vmatprep.subr.bf16.mxu0 %v3782_v58 }
 0x311   : > { %v1608_v17 = vadd.f32 %v1607_v8, %v5250_v36  ;;  %v1720_v18 = vpop.f32.mrb[75].mxu1  ;;  %v4295_v19 = vpop.eup %4294  ;;  %4314 = vtanh.f32 %v1606_v40  ;;  %3799 = vmatprep.subr.bf16.mxu1 %v3798_v15  ;;  %3785 = vmatpush1.bf16.msra.mxu0 %v3784_v10 }
 0x312   : > { %v1721_v29 = vadd.f32 %v1720_v18, %v5250_v36  ;;  %v4297_v24 = vpop.eup %4296  ;;  %4316 = vtanh.f32 %v1719_v62  ;;  %3801 = vmatpush1.bf16.msra.mxu1 %v3800_v6  ;;  %v1611_v20 = vpop.f32.mrb[76].mxu0 }
 0x313   : > { %v4299_v21 = vpop.eup %4298  ;;  %4318 = vtanh.f32 %v1608_v17  ;;  %v1612_v23 = vadd.f32 %v1611_v20, %v5256_v44  ;;  %v1724_v26 = vpop.f32.mrb[76].mxu1 }
 0x314   : > { %v1613_v27 = vpop.f32.mrb[77].mxu0  ;;  %v4301_v11 = vpop.eup %4300  ;;  %4320 = vtanh.f32 %v1721_v29  ;;  %v1725_v28 = vadd.f32 %v1724_v26, %v5256_v44  ;;  %v3788_v32 = vpack.c.bf16 %v4299_v21, %v4291_v12 }
 0x315   : > { %v1614_v30 = vadd.f32 %v1613_v27, %v5256_v44  ;;  %v1726_v31 = vpop.f32.mrb[77].mxu1  ;;  %v4303_v33 = vpop.eup %4302  ;;  %4322 = vtanh.f32 %v1612_v23  ;;  %v3804_v38 = vpack.c.bf16 %v4301_v11, %v4293_v22 }
 0x316   : > { %v1727_v37 = vadd.f32 %v1726_v31, %v5256_v44  ;;  %v4305_v39 = vpop.eup %4304  ;;  %4324 = vtanh.f32 %v1725_v28  ;;  %v1617_v35 = vpop.f32.mrb[78].mxu0  ;;  %v3786_v41 = vpack.c.bf16 %v4303_v33, %v4295_v19 }
 0x317   : > { %v4307_v25 = vpop.eup %4306  ;;  %4326 = vtanh.f32 %v1614_v30  ;;  %v1618_v43 = vadd.f32 %v1617_v35, %v5262_v9  ;;  %v1730_v47 = vpop.f32.mrb[78].mxu1  ;;  %v3802_v49 = vpack.c.bf16 %v4305_v39, %v4297_v24 }
 0x318   : > { %v1619_v48 = vpop.f32.mrb[79].mxu0  ;;  %v4309_v50 = vpop.eup %4308  ;;  %4328 = vtanh.f32 %v1727_v37  ;;  %v1731_v51 = vadd.f32 %v1730_v47, %v5262_v9  ;;  %3787 = vmatprep.subr.bf16.mxu0 %v3786_v41 }
 0x319   : > { %v1620_v52 = vadd.f32 %v1619_v48, %v5262_v9  ;;  %v1732_v53 = vpop.f32.mrb[79].mxu1  ;;  %v4311_v56 = vpop.eup %4310  ;;  %4330 = vtanh.f32 %v1618_v43  ;;  %3803 = vmatprep.subr.bf16.mxu1 %v3802_v49  ;;  %3789 = vmatpush1.bf16.msra.mxu0 %v3788_v32 }
 0x31a   : > { %v1733_v42 = vadd.f32 %v1732_v53, %v5262_v9  ;;  %v4313_v57 = vpop.eup %4312  ;;  %4332 = vtanh.f32 %v1731_v51  ;;  %3805 = vmatpush1.bf16.msra.mxu1 %v3804_v38 }
 0x31b   : > { %v4315_v59 = vpop.eup %4314  ;;  %4334 = vtanh.f32 %v1620_v52  ;;  %v1801_v60 = vpop.f32.mrb[80].mxu0 }
 0x31c   : > { %v4317_v61 = vpop.eup %4316  ;;  %4336 = vtanh.f32 %v1733_v42  ;;  %v1802_v63 = vadd.f32 %v1801_v60, %v5220_v34  ;;  %v1914_v1 = vpop.f32.mrb[80].mxu1  ;;  %v3792_v10 = vpack.c.bf16 %v4315_v59, %v4307_v25 }
 0x31d   : > { %v1803_v3 = vpop.f32.mrb[81].mxu0  ;;  %v4319_v4 = vpop.eup %4318  ;;  %v1915_v5 = vadd.f32 %v1914_v1, %v5220_v34  ;;  %v3808_v7 = vpack.c.bf16 %v4317_v61, %v4309_v50 }
 0x31e   : > { %v1804_v6 = vadd.f32 %v1803_v3, %v5220_v34  ;;  %v1916_v45 = vpop.f32.mrb[81].mxu1  ;;  %v4321_v58 = vpop.eup %4320  ;;  %4338 = vtanh.f32 %v1802_v63  ;;  %v3790_v40 = vpack.c.bf16 %v4319_v4, %v4311_v56 }
 0x31f   : > { %v1917_v12 = vadd.f32 %v1916_v45, %v5220_v34  ;;  %v4323_v55 = vpop.eup %4322  ;;  %4340 = vtanh.f32 %v1915_v5  ;;  %v1807_v8 = vpop.f32.mrb[82].mxu0  ;;  %v3806_v15 = vpack.c.bf16 %v4321_v58, %v4313_v57 }
 0x320   : > { %v4325_v22 = vpop.eup %4324  ;;  %4342 = vtanh.f32 %v1804_v6  ;;  %v1808_v62 = vadd.f32 %v1807_v8, %v5226_v46  ;;  %v1920_v17 = vpop.f32.mrb[82].mxu1  ;;  %3791 = vmatprep.subr.bf16.mxu0 %v3790_v40 }
 0x321   : > { %v1809_v18 = vpop.f32.mrb[83].mxu0  ;;  %v4327_v19 = vpop.eup %4326  ;;  %4344 = vtanh.f32 %v1917_v12  ;;  %v1921_v29 = vadd.f32 %v1920_v17, %v5226_v46  ;;  %3807 = vmatprep.subr.bf16.mxu1 %v3806_v15  ;;  %3793 = vmatpush1.bf16.msra.mxu0 %v3792_v10 }
 0x322   : > { %v1810_v24 = vadd.f32 %v1809_v18, %v5226_v46  ;;  %v1922_v20 = vpop.f32.mrb[83].mxu1  ;;  %v4329_v21 = vpop.eup %4328  ;;  %4346 = vtanh.f32 %v1808_v62  ;;  %3809 = vmatpush1.bf16.msra.mxu1 %v3808_v7 }
 0x323   : > { %v1923_v23 = vadd.f32 %v1922_v20, %v5226_v46  ;;  %v4331_v26 = vpop.eup %4330  ;;  %4348 = vtanh.f32 %v1921_v29  ;;  %v1813_v27 = vpop.f32.mrb[84].mxu0 }
 0x324   : > { %v4333_v11 = vpop.eup %4332  ;;  %4350 = vtanh.f32 %v1810_v24  ;;  %v1814_v28 = vadd.f32 %v1813_v27, %v5232_v54  ;;  %v1926_v30 = vpop.f32.mrb[84].mxu1  ;;  %v3796_v32 = vpack.c.bf16 %v4331_v26, %v4323_v55 }
 0x325   : > { %v1815_v31 = vpop.f32.mrb[85].mxu0  ;;  %v4335_v33 = vpop.eup %4334  ;;  %4352 = vtanh.f32 %v1923_v23  ;;  %v1927_v37 = vadd.f32 %v1926_v30, %v5232_v54  ;;  %v3812_v35 = vpack.c.bf16 %v4333_v11, %v4325_v22 }
 0x326   : > { %v1816_v38 = vadd.f32 %v1815_v31, %v5232_v54  ;;  %v1928_v39 = vpop.f32.mrb[85].mxu1  ;;  %v4337_v41 = vpop.eup %4336  ;;  %4354 = vtanh.f32 %v1814_v28  ;;  %v3794_v43 = vpack.c.bf16 %v4335_v33, %v4327_v19 }
 0x327   : > { %v1929_v25 = vadd.f32 %v1928_v39, %v5232_v54  ;;  %4356 = vtanh.f32 %v1927_v37  ;;  %v1819_v47 = vpop.f32.mrb[86].mxu0  ;;  %v3810_v48 = vpack.c.bf16 %v4337_v41, %v4329_v21  ;;  %v5485_v37 = vld [vmem:[%s5910_s3 + $0x10] sm:$0xff] }
 0x328   : > { %v4339_v49 = vpop.eup %4338  ;;  %4358 = vtanh.f32 %v1816_v38  ;;  %v1820_v50 = vadd.f32 %v1819_v47, %v5238_v2  ;;  %v1932_v51 = vpop.f32.mrb[86].mxu1  ;;  %3795 = vmatprep.subr.bf16.mxu0 %v3794_v43 }
 0x329   : > { %v1821_v52 = vpop.f32.mrb[87].mxu0  ;;  %v4341_v53 = vpop.eup %4340  ;;  %4360 = vtanh.f32 %v1929_v25  ;;  %v1933_v56 = vadd.f32 %v1932_v51, %v5238_v2  ;;  %3811 = vmatprep.subr.bf16.mxu1 %v3810_v48  ;;  %3797 = vmatpush1.bf16.msra.mxu0 %v3796_v32 }
 0x32a   : > { %v1822_v42 = vadd.f32 %v1821_v52, %v5238_v2  ;;  %v1934_v57 = vpop.f32.mrb[87].mxu1  ;;  %v4343_v59 = vpop.eup %4342  ;;  %4362 = vtanh.f32 %v1820_v50  ;;  %3813 = vmatpush1.bf16.msra.mxu1 %v3812_v35 }
 0x32b   : > { %v1935_v60 = vadd.f32 %v1934_v57, %v5238_v2  ;;  %v4345_v61 = vpop.eup %4344  ;;  %4364 = vtanh.f32 %v1933_v56  ;;  %v1825_v63 = vpop.f32.mrb[88].mxu0  ;;  %v5502_v57 = vld [vmem:[%s5910_s3 + $0x18] sm:$0xff] }
 0x32c   : > { %v4347_v1 = vpop.eup %4346  ;;  %4366 = vtanh.f32 %v1822_v42  ;;  %v1826_v3 = vadd.f32 %v1825_v63, %v5244_v16  ;;  %v1938_v10 = vpop.f32.mrb[88].mxu1  ;;  %3580 = vmatmul.mubr.msk.f32.vlgmr.msra.gmra.mrb[96].mxu0 %vm968_vm2, %v5354_v13 }
 0x32d   : > { %v1827_v4 = vpop.f32.mrb[89].mxu0  ;;  %v4349_v5 = vpop.eup %4348  ;;  %4368 = vtanh.f32 %v1935_v60  ;;  %v1939_v6 = vadd.f32 %v1938_v10, %v5244_v16  ;;  %3588 = vmatmul.mubr.msk.f32.vlgmr.msra.gmra.mrb[96].mxu1 %vm968_vm2, %v5354_v13  ;;  %2095 = vmatprep.mubr.f32.mxu0 %v4732_v0  ;;  %v3816_v58 = vpack.c.bf16 %v4347_v1, %v4339_v49 }
 0x32e   : > { %v1828_v45 = vadd.f32 %v1827_v4, %v5244_v16  ;;  %v1940_v7 = vpop.f32.mrb[89].mxu1  ;;  %v4351_v12 = vpop.eup %4350  ;;  %4370 = vtanh.f32 %v1826_v3  ;;  %2208 = vmatprep.mubr.f32.mxu1 %v4732_v0  ;;  %v3832_v55 = vpack.c.bf16 %v4349_v5, %v4341_v53 }
 0x32f   : > { %v1941_v40 = vadd.f32 %v1940_v7, %v5244_v16  ;;  %v4353_v8 = vpop.eup %4352  ;;  %4372 = vtanh.f32 %v1939_v6  ;;  %v1831_v15 = vpop.f32.mrb[90].mxu0  ;;  %v3814_v22 = vpack.c.bf16 %v4351_v12, %v4343_v59  ;;  %v5516_v6 = vld [vmem:[%s5910_s3 + $0x20] sm:$0xff] }
 0x330   : > { %v5467_v62 = vpop.eup %4354  ;;  %4374 = vtanh.f32 %v1828_v45  ;;  %v1832_v17 = vadd.f32 %v1831_v15, %v5250_v36  ;;  %v1944_v18 = vpop.f32.mrb[90].mxu1  ;;  %3581 = vmatmul.mubr.msk.f32.gmra.mrb[98].mxu0 %vm968_vm2, %v5365_v14  ;;  %v3830_v29 = vpack.c.bf16 %v4353_v8, %v4345_v61  ;;  %v5527_v15 = vld [vmem:[%s5910_s3 + $0x28] sm:$0xff] }
 0x331   : > { %v1833_v19 = vpop.f32.mrb[91].mxu0  ;;  %v5472_v24 = vpop.eup %4356  ;;  %4376 = vtanh.f32 %v1941_v40  ;;  %v1945_v20 = vadd.f32 %v1944_v18, %v5250_v36  ;;  %3589 = vmatmul.mubr.msk.f32.gmra.mrb[98].mxu1 %vm968_vm2, %v5365_v14  ;;  %3815 = vmatprep.subr.bf16.mxu0 %v3814_v22 }
 0x332   : > { %v1834_v21 = vadd.f32 %v1833_v19, %v5250_v36  ;;  %v1946_v23 = vpop.f32.mrb[91].mxu1  ;;  %v4359_v26 = vpop.eup %4358  ;;  %4378 = vtanh.f32 %v1832_v17  ;;  %3831 = vmatprep.subr.bf16.mxu1 %v3830_v29  ;;  %3817 = vmatpush1.bf16.msra.mxu0 %v3816_v58  ;;  %v5538_v29 = vld [vmem:[%s5910_s3 + $0x30] sm:$0xff] }
 0x333   : > { %v1947_v27 = vadd.f32 %v1946_v23, %v5250_v36  ;;  %v4361_v11 = vpop.eup %4360  ;;  %4380 = vtanh.f32 %v1945_v20  ;;  %3833 = vmatpush1.bf16.msra.mxu1 %v3832_v55  ;;  %v1837_v28 = vpop.f32.mrb[92].mxu0  ;;  %2101 = vmatprep.mubr.f32.mxu0 %v4732_v0 }
 0x334   : > { %v4363_v30 = vpop.eup %4362  ;;  %4382 = vtanh.f32 %v1834_v21  ;;  %v1838_v31 = vadd.f32 %v1837_v28, %v5256_v44  ;;  %v1950_v32 = vpop.f32.mrb[92].mxu1  ;;  %2214 = vmatprep.mubr.f32.mxu1 %v4732_v0  ;;  %3582 = vmatmul.mubr.msk.f32.gmra.mrb[100].mxu0 %vm968_vm2, %v5485_v37 }
 0x335   : > { %v1839_v33 = vpop.f32.mrb[93].mxu0  ;;  %v4365_v38 = vpop.eup %4364  ;;  %4384 = vtanh.f32 %v1947_v27  ;;  %v1951_v39 = vadd.f32 %v1950_v32, %v5256_v44  ;;  %3590 = vmatmul.mubr.msk.f32.gmra.mrb[100].mxu1 %vm968_vm2, %v5485_v37  ;;  %2107 = vmatprep.mubr.f32.mxu0 %v4732_v0  ;;  %v3820_v25 = vpack.c.bf16 %v4363_v30, %v5467_v62 }
 0x336   : > { %v1840_v35 = vadd.f32 %v1839_v33, %v5256_v44  ;;  %v1952_v41 = vpop.f32.mrb[93].mxu1  ;;  %v4367_v43 = vpop.eup %4366  ;;  %4386 = vtanh.f32 %v1838_v31  ;;  %2220 = vmatprep.mubr.f32.mxu1 %v4732_v0  ;;  %v3836_v48 = vpack.c.bf16 %v4365_v38, %v5472_v24 }
 0x337   : > { %v1953_v47 = vadd.f32 %v1952_v41, %v5256_v44  ;;  %v4369_v49 = vpop.eup %4368  ;;  %4388 = vtanh.f32 %v1951_v39  ;;  %v1843_v50 = vpop.f32.mrb[94].mxu0  ;;  %v3818_v51 = vpack.c.bf16 %v4367_v43, %v4359_v26 }
 0x338   : > { %v4371_v52 = vpop.eup %4370  ;;  %4390 = vtanh.f32 %v1840_v35  ;;  %v1844_v53 = vadd.f32 %v1843_v50, %v5262_v9  ;;  %v1956_v56 = vpop.f32.mrb[94].mxu1  ;;  %3583 = vmatmul.mubr.msk.f32.gmra.mrb[102].mxu0 %vm968_vm2, %v5502_v57  ;;  %v3834_v59 = vpack.c.bf16 %v4369_v49, %v4361_v11  ;;  %v5549_v11 = vld [vmem:[%s5910_s3 + $0x38] sm:$0xff] }
 0x339   : > { %v1845_v42 = vpop.f32.mrb[95].mxu0  ;;  %v4373_v60 = vpop.eup %4372  ;;  %4392 = vtanh.f32 %v1953_v47  ;;  %v1957_v61 = vadd.f32 %v1956_v56, %v5262_v9  ;;  %3591 = vmatmul.mubr.msk.f32.gmra.mrb[102].mxu1 %vm968_vm2, %v5502_v57  ;;  %3819 = vmatprep.subr.bf16.mxu0 %v3818_v51 }
 0x33a   : > { %v1846_v63 = vadd.f32 %v1845_v42, %v5262_v9  ;;  %v1958_v1 = vpop.f32.mrb[95].mxu1  ;;  %v4375_v3 = vpop.eup %4374  ;;  %4394 = vtanh.f32 %v1844_v53  ;;  %3835 = vmatprep.subr.bf16.mxu1 %v3834_v59  ;;  %3821 = vmatpush1.bf16.msra.mxu0 %v3820_v25 }
 0x33b   : > { %v1959_v10 = vadd.f32 %v1958_v1, %v5262_v9  ;;  %v4377_v4 = vpop.eup %4376  ;;  %4396 = vtanh.f32 %v1957_v61  ;;  %3837 = vmatpush1.bf16.msra.mxu1 %v3836_v48  ;;  %2113 = vmatprep.mubr.f32.mxu0 %v4732_v0 }
 0x33c   : > { %v4379_v5 = vpop.eup %4378  ;;  %4398 = vtanh.f32 %v1846_v63  ;;  %2226 = vmatprep.mubr.f32.mxu1 %v4732_v0  ;;  %3584 = vmatmul.mubr.msk.f32.gmra.mrb[104].mxu0 %vm968_vm2, %v5516_v6 }
 0x33d   : > { %v4381_v45 = vpop.eup %4380  ;;  %4400 = vtanh.f32 %v1959_v10  ;;  %3592 = vmatmul.mubr.msk.f32.gmra.mrb[104].mxu1 %vm968_vm2, %v5516_v6  ;;  %2119 = vmatprep.mubr.f32.mxu0 %v4732_v0  ;;  %v3824_v7 = vpack.c.bf16 %v4379_v5, %v4371_v52 }
 0x33e   : > { %v4383_v58 = vpop.eup %4382  ;;  %2232 = vmatprep.mubr.f32.mxu1 %v4732_v0  ;;  %v3840_v12 = vpack.c.bf16 %v4381_v45, %v4373_v60 }
 0x33f   : > { %v4385_v40 = vpop.eup %4384  ;;  %v3822_v55 = vpack.c.bf16 %v4383_v58, %v4375_v3 }
 0x340   : > { %v4387_v8 = vpop.eup %4386  ;;  %3585 = vmatmul.mubr.msk.f32.gmra.mrb[106].mxu0 %vm968_vm2, %v5527_v15  ;;  %v3838_v22 = vpack.c.bf16 %v4385_v40, %v4377_v4 }
 0x341   : > { %v4389_v62 = vpop.eup %4388  ;;  %3593 = vmatmul.mubr.msk.f32.gmra.mrb[106].mxu1 %vm968_vm2, %v5527_v15  ;;  %3823 = vmatprep.subr.bf16.mxu0 %v3822_v55 }
 0x342   : > { %v4391_v17 = vpop.eup %4390  ;;  %3839 = vmatprep.subr.bf16.mxu1 %v3838_v22  ;;  %3825 = vmatpush1.bf16.msra.mxu0 %v3824_v7 }
 0x343   : > { %v4393_v18 = vpop.eup %4392  ;;  %3841 = vmatpush1.bf16.msra.mxu1 %v3840_v12  ;;  %2125 = vmatprep.mubr.f32.mxu0 %v4732_v0 }
 0x344   : > { %v4395_v19 = vpop.eup %4394  ;;  %2238 = vmatprep.mubr.f32.mxu1 %v4732_v0  ;;  %3586 = vmatmul.mubr.msk.f32.gmra.mrb[108].mxu0 %vm968_vm2, %v5538_v29 }
 0x345   : > { %v4397_v24 = vpop.eup %4396  ;;  %3594 = vmatmul.mubr.msk.f32.gmra.mrb[108].mxu1 %vm968_vm2, %v5538_v29  ;;  %2131 = vmatprep.mubr.f32.mxu0 %v4732_v0  ;;  %v3828_v20 = vpack.c.bf16 %v4395_v19, %v4387_v8 }
 0x346   : > { %v4399_v21 = vpop.eup %4398  ;;  %2244 = vmatprep.mubr.f32.mxu1 %v4732_v0  ;;  %v3844_v23 = vpack.c.bf16 %v4397_v24, %v4389_v62 }
 0x347   : > { %v4401_v26 = vpop.eup %4400  ;;  %v3826_v27 = vpack.c.bf16 %v4399_v21, %v4391_v17 }
 0x348   : > { %3587 = vmatmul.mubr.msk.f32.gmra.mrb[110].mxu0 %vm968_vm2, %v5549_v11  ;;  %v3842_v28 = vpack.c.bf16 %v4401_v26, %v4393_v18 }
 0x349   : > { %3595 = vmatmul.mubr.msk.f32.gmra.mrb[110].mxu1 %vm968_vm2, %v5549_v11  ;;  %3827 = vmatprep.subr.bf16.mxu0 %v3826_v27 }
 0x34a   : > { %3843 = vmatprep.subr.bf16.mxu1 %v3842_v28  ;;  %3829 = vmatpush1.bf16.msra.mxu0 %v3828_v20 }
 0x34b   : > { %3845 = vmatpush1.bf16.msra.mxu1 %v3844_v23  ;;  %2315 = vmatprep.mubr.f32.mxu0 %v4732_v0 }
 0x34c   : > { %2428 = vmatprep.mubr.f32.mxu1 %v4732_v0 }
 0x34d   : > { %3596 = vmatmul.mubr.msk.f32.vlgmr.msra.gmra.mrb[112].mxu0 %vm968_vm2, %v5354_v13 }
 0x34e   : > { %3604 = vmatmul.mubr.msk.f32.vlgmr.msra.gmra.mrb[112].mxu1 %vm968_vm2, %v5354_v13  ;;  %2321 = vmatprep.mubr.f32.mxu0 %v4732_v0 }
 0x34f   : > { %2434 = vmatprep.mubr.f32.mxu1 %v4732_v0 }
 0x351   : > { %3597 = vmatmul.mubr.msk.f32.gmra.mrb[114].mxu0 %vm968_vm2, %v5365_v14 }
 0x352   : > { %3605 = vmatmul.mubr.msk.f32.gmra.mrb[114].mxu1 %vm968_vm2, %v5365_v14  ;;  %2327 = vmatprep.mubr.f32.mxu0 %v4732_v0 }
 0x353   : > { %2440 = vmatprep.mubr.f32.mxu1 %v4732_v0 }
 0x355   : > { %3598 = vmatmul.mubr.msk.f32.gmra.mrb[116].mxu0 %vm968_vm2, %v5485_v37 }
 0x356   : > { %3606 = vmatmul.mubr.msk.f32.gmra.mrb[116].mxu1 %vm968_vm2, %v5485_v37  ;;  %2333 = vmatprep.mubr.f32.mxu0 %v4732_v0 }
 0x357   : > { %2446 = vmatprep.mubr.f32.mxu1 %v4732_v0 }
 0x359   : > { %3599 = vmatmul.mubr.msk.f32.gmra.mrb[118].mxu0 %vm968_vm2, %v5502_v57 }
 0x35a   : > { %3607 = vmatmul.mubr.msk.f32.gmra.mrb[118].mxu1 %vm968_vm2, %v5502_v57  ;;  %2339 = vmatprep.mubr.f32.mxu0 %v4732_v0 }
 0x35b   : > { %2452 = vmatprep.mubr.f32.mxu1 %v4732_v0 }
 0x35d   : > { %3600 = vmatmul.mubr.msk.f32.gmra.mrb[120].mxu0 %vm968_vm2, %v5516_v6 }
 0x35e   : > { %3608 = vmatmul.mubr.msk.f32.gmra.mrb[120].mxu1 %vm968_vm2, %v5516_v6  ;;  %2345 = vmatprep.mubr.f32.mxu0 %v4732_v0 }
 0x35f   : > { %2458 = vmatprep.mubr.f32.mxu1 %v4732_v0 }
 0x361   : > { %3601 = vmatmul.mubr.msk.f32.gmra.mrb[122].mxu0 %vm968_vm2, %v5527_v15 }
 0x362   : > { %3609 = vmatmul.mubr.msk.f32.gmra.mrb[122].mxu1 %vm968_vm2, %v5527_v15  ;;  %2351 = vmatprep.mubr.f32.mxu0 %v4732_v0 }
 0x363   : > { %2464 = vmatprep.mubr.f32.mxu1 %v4732_v0 }
 0x365   : > { %3602 = vmatmul.mubr.msk.f32.gmra.mrb[124].mxu0 %vm968_vm2, %v5538_v29 }
 0x366   : > { %3610 = vmatmul.mubr.msk.f32.gmra.mrb[124].mxu1 %vm968_vm2, %v5538_v29  ;;  %2357 = vmatprep.mubr.f32.mxu0 %v4732_v0 }
 0x367   : > { %2470 = vmatprep.mubr.f32.mxu1 %v4732_v0 }
 0x369   : > { %3603 = vmatmul.mubr.msk.f32.gmra.mrb[126].mxu0 %vm968_vm2, %v5549_v11 }
 0x36a   : > { %3611 = vmatmul.mubr.msk.f32.gmra.mrb[126].mxu1 %vm968_vm2, %v5549_v11  ;;  %2605 = vmatprep.mubr.f32.mxu0 %v4732_v0 }
 0x36b   : > { %2718 = vmatprep.mubr.f32.mxu1 %v4732_v0 }
 0x3ff   : > { %v2091_v13 = vpop.f32.mrb[96].mxu0 }
 0x400   : > { %v2092_v14 = vadd.f32 %v2091_v13, %v5220_v34  ;;  %v2204_v30 = vpop.f32.mrb[96].mxu1  ;;  %v2093_v31 = vpop.f32.mrb[97].mxu0 }
 0x401   : > { %v2205_v32 = vadd.f32 %v2204_v30, %v5220_v34  ;;  %v2094_v33 = vadd.f32 %v2093_v31, %v5220_v34  ;;  %v2206_v38 = vpop.f32.mrb[97].mxu1 }
 0x402   : > { %4402 = vtanh.f32 %v2092_v14  ;;  %v2207_v39 = vadd.f32 %v2206_v38, %v5220_v34 }
 0x403   : > { %4404 = vtanh.f32 %v2205_v32  ;;  %v2097_v35 = vpop.f32.mrb[98].mxu0 }
 0x404   : > { %4406 = vtanh.f32 %v2094_v33  ;;  %v2098_v41 = vadd.f32 %v2097_v35, %v5226_v46  ;;  %v2210_v25 = vpop.f32.mrb[98].mxu1  ;;  %v2099_v43 = vpop.f32.mrb[99].mxu0 }
 0x405   : > { %4408 = vtanh.f32 %v2207_v39  ;;  %v2211_v47 = vadd.f32 %v2210_v25, %v5226_v46  ;;  %v2100_v48 = vadd.f32 %v2099_v43, %v5226_v46  ;;  %v2212_v49 = vpop.f32.mrb[99].mxu1 }
 0x406   : > { %4410 = vtanh.f32 %v2098_v41  ;;  %v2213_v50 = vadd.f32 %v2212_v49, %v5226_v46 }
 0x407   : > { %4412 = vtanh.f32 %v2211_v47  ;;  %v2103_v51 = vpop.f32.mrb[100].mxu0 }
 0x408   : > { %4414 = vtanh.f32 %v2100_v48  ;;  %v2104_v52 = vadd.f32 %v2103_v51, %v5232_v54  ;;  %v2216_v53 = vpop.f32.mrb[100].mxu1  ;;  %v2105_v56 = vpop.f32.mrb[101].mxu0 }
 0x409   : > { %4416 = vtanh.f32 %v2213_v50  ;;  %v2217_v42 = vadd.f32 %v2216_v53, %v5232_v54  ;;  %v2106_v59 = vadd.f32 %v2105_v56, %v5232_v54  ;;  %v2218_v60 = vpop.f32.mrb[101].mxu1 }
 0x40a   : > { %4418 = vtanh.f32 %v2104_v52  ;;  %v2219_v61 = vadd.f32 %v2218_v60, %v5232_v54 }
 0x40b   : > { %4420 = vtanh.f32 %v2217_v42  ;;  %v2109_v63 = vpop.f32.mrb[102].mxu0 }
 0x40c   : > { %v4403_v1 = vpop.eup %4402  ;;  %4422 = vtanh.f32 %v2106_v59  ;;  %v2110_v3 = vadd.f32 %v2109_v63, %v5238_v2  ;;  %v2222_v10 = vpop.f32.mrb[102].mxu1 }
 0x40d   : > { %v2111_v4 = vpop.f32.mrb[103].mxu0  ;;  %v4405_v5 = vpop.eup %4404  ;;  %4424 = vtanh.f32 %v2219_v61  ;;  %v2223_v45 = vadd.f32 %v2222_v10, %v5238_v2 }
 0x40e   : > { %v2112_v7 = vadd.f32 %v2111_v4, %v5238_v2  ;;  %v2224_v58 = vpop.f32.mrb[103].mxu1  ;;  %v4407_v12 = vpop.eup %4406  ;;  %4426 = vtanh.f32 %v2110_v3 }
 0x40f   : > { %v2225_v40 = vadd.f32 %v2224_v58, %v5238_v2  ;;  %v4409_v55 = vpop.eup %4408  ;;  %4428 = vtanh.f32 %v2223_v45  ;;  %v2115_v8 = vpop.f32.mrb[104].mxu0 }
 0x410   : > { %v4411_v22 = vpop.eup %4410  ;;  %4430 = vtanh.f32 %v2112_v7  ;;  %v2116_v62 = vadd.f32 %v2115_v8, %v5244_v16  ;;  %v2228_v17 = vpop.f32.mrb[104].mxu1 }
 0x411   : > { %v2117_v18 = vpop.f32.mrb[105].mxu0  ;;  %v4413_v19 = vpop.eup %4412  ;;  %4432 = vtanh.f32 %v2225_v40  ;;  %v2229_v24 = vadd.f32 %v2228_v17, %v5244_v16  ;;  %v3848_v23 = vpack.c.bf16 %v4411_v22, %v4403_v1 }
 0x412   : > { %v2118_v20 = vadd.f32 %v2117_v18, %v5244_v16  ;;  %v2230_v21 = vpop.f32.mrb[105].mxu1  ;;  %v4415_v26 = vpop.eup %4414  ;;  %4434 = vtanh.f32 %v2116_v62  ;;  %v3864_v28 = vpack.c.bf16 %v4413_v19, %v4405_v5 }
 0x413   : > { %v2231_v27 = vadd.f32 %v2230_v21, %v5244_v16  ;;  %v4417_v13 = vpop.eup %4416  ;;  %4436 = vtanh.f32 %v2229_v24  ;;  %v2121_v14 = vpop.f32.mrb[106].mxu0  ;;  %v3846_v30 = vpack.c.bf16 %v4415_v26, %v4407_v12 }
 0x414   : > { %v4419_v31 = vpop.eup %4418  ;;  %4438 = vtanh.f32 %v2118_v20  ;;  %v2122_v32 = vadd.f32 %v2121_v14, %v5250_v36  ;;  %v2234_v33 = vpop.f32.mrb[106].mxu1  ;;  %v3862_v39 = vpack.c.bf16 %v4417_v13, %v4409_v55 }
 0x415   : > { %v2123_v38 = vpop.f32.mrb[107].mxu0  ;;  %v4421_v35 = vpop.eup %4420  ;;  %4440 = vtanh.f32 %v2231_v27  ;;  %v2235_v41 = vadd.f32 %v2234_v33, %v5250_v36  ;;  %3847 = vmatprep.subr.bf16.mxu0 %v3846_v30 }
 0x416   : > { %v2124_v25 = vadd.f32 %v2123_v38, %v5250_v36  ;;  %v2236_v43 = vpop.f32.mrb[107].mxu1  ;;  %v4423_v47 = vpop.eup %4422  ;;  %4442 = vtanh.f32 %v2122_v32  ;;  %3863 = vmatprep.subr.bf16.mxu1 %v3862_v39  ;;  %3849 = vmatpush1.bf16.msra.mxu0 %v3848_v23 }
 0x417   : > { %v2237_v48 = vadd.f32 %v2236_v43, %v5250_v36  ;;  %v4425_v49 = vpop.eup %4424  ;;  %4444 = vtanh.f32 %v2235_v41  ;;  %3865 = vmatpush1.bf16.msra.mxu1 %v3864_v28  ;;  %v2127_v50 = vpop.f32.mrb[108].mxu0 }
 0x418   : > { %v4427_v51 = vpop.eup %4426  ;;  %4446 = vtanh.f32 %v2124_v25  ;;  %v2128_v52 = vadd.f32 %v2127_v50, %v5256_v44  ;;  %v2240_v53 = vpop.f32.mrb[108].mxu1 }
 0x419   : > { %v2129_v56 = vpop.f32.mrb[109].mxu0  ;;  %v4429_v42 = vpop.eup %4428  ;;  %4448 = vtanh.f32 %v2237_v48  ;;  %v2241_v59 = vadd.f32 %v2240_v53, %v5256_v44  ;;  %v3852_v63 = vpack.c.bf16 %v4427_v51, %v4419_v31 }
 0x41a   : > { %v2130_v60 = vadd.f32 %v2129_v56, %v5256_v44  ;;  %v2242_v61 = vpop.f32.mrb[109].mxu1  ;;  %v4431_v1 = vpop.eup %4430  ;;  %4450 = vtanh.f32 %v2128_v52  ;;  %v3868_v10 = vpack.c.bf16 %v4429_v42, %v4421_v35 }
 0x41b   : > { %v2243_v3 = vadd.f32 %v2242_v61, %v5256_v44  ;;  %v4433_v4 = vpop.eup %4432  ;;  %4452 = vtanh.f32 %v2241_v59  ;;  %v2133_v5 = vpop.f32.mrb[110].mxu0  ;;  %v3850_v45 = vpack.c.bf16 %v4431_v1, %v4423_v47 }
 0x41c   : > { %v4435_v7 = vpop.eup %4434  ;;  %4454 = vtanh.f32 %v2130_v60  ;;  %v2134_v58 = vadd.f32 %v2133_v5, %v5262_v9  ;;  %v2246_v12 = vpop.f32.mrb[110].mxu1  ;;  %v3866_v55 = vpack.c.bf16 %v4433_v4, %v4425_v49 }
 0x41d   : > { %v2135_v40 = vpop.f32.mrb[111].mxu0  ;;  %v4437_v8 = vpop.eup %4436  ;;  %4456 = vtanh.f32 %v2243_v3  ;;  %v2247_v22 = vadd.f32 %v2246_v12, %v5262_v9  ;;  %3851 = vmatprep.subr.bf16.mxu0 %v3850_v45 }
 0x41e   : > { %v2136_v62 = vadd.f32 %v2135_v40, %v5262_v9  ;;  %v2248_v17 = vpop.f32.mrb[111].mxu1  ;;  %v4439_v18 = vpop.eup %4438  ;;  %4458 = vtanh.f32 %v2134_v58  ;;  %3867 = vmatprep.subr.bf16.mxu1 %v3866_v55  ;;  %3853 = vmatpush1.bf16.msra.mxu0 %v3852_v63 }
 0x41f   : > { %v2249_v19 = vadd.f32 %v2248_v17, %v5262_v9  ;;  %v4441_v24 = vpop.eup %4440  ;;  %4460 = vtanh.f32 %v2247_v22  ;;  %3869 = vmatpush1.bf16.msra.mxu1 %v3868_v10 }
 0x420   : > { %v4443_v20 = vpop.eup %4442  ;;  %4462 = vtanh.f32 %v2136_v62  ;;  %v2317_v21 = vpop.f32.mrb[112].mxu0 }
 0x421   : > { %v4445_v23 = vpop.eup %4444  ;;  %4464 = vtanh.f32 %v2249_v19  ;;  %v2318_v26 = vadd.f32 %v2317_v21, %v5220_v34  ;;  %v2430_v27 = vpop.f32.mrb[112].mxu1  ;;  %v3856_v13 = vpack.c.bf16 %v4443_v20, %v4435_v7 }
 0x422   : > { %v2319_v28 = vpop.f32.mrb[113].mxu0  ;;  %v4447_v14 = vpop.eup %4446  ;;  %v2431_v30 = vadd.f32 %v2430_v27, %v5220_v34  ;;  %v3872_v33 = vpack.c.bf16 %v4445_v23, %v4437_v8 }
 0x423   : > { %v2320_v31 = vadd.f32 %v2319_v28, %v5220_v34  ;;  %v2432_v32 = vpop.f32.mrb[113].mxu1  ;;  %v4449_v38 = vpop.eup %4448  ;;  %4466 = vtanh.f32 %v2318_v26  ;;  %v3854_v35 = vpack.c.bf16 %v4447_v14, %v4439_v18 }
 0x424   : > { %v2433_v39 = vadd.f32 %v2432_v32, %v5220_v34  ;;  %v4451_v41 = vpop.eup %4450  ;;  %4468 = vtanh.f32 %v2431_v30  ;;  %v2323_v25 = vpop.f32.mrb[114].mxu0  ;;  %v3870_v43 = vpack.c.bf16 %v4449_v38, %v4441_v24  ;;  %v5659_v38 = vld [vmem:[%s5910_s3] sm:$0xff] }
 0x425   : > { %v4453_v47 = vpop.eup %4452  ;;  %4470 = vtanh.f32 %v2320_v31  ;;  %v2324_v48 = vadd.f32 %v2323_v25, %v5226_v46  ;;  %v2436_v49 = vpop.f32.mrb[114].mxu1  ;;  %3855 = vmatprep.subr.bf16.mxu0 %v3854_v35 }
 0x426   : > { %v2325_v50 = vpop.f32.mrb[115].mxu0  ;;  %v4455_v51 = vpop.eup %4454  ;;  %4472 = vtanh.f32 %v2433_v39  ;;  %v2437_v52 = vadd.f32 %v2436_v49, %v5226_v46  ;;  %3871 = vmatprep.subr.bf16.mxu1 %v3870_v43  ;;  %3857 = vmatpush1.bf16.msra.mxu0 %v3856_v13 }
 0x427   : > { %v2326_v53 = vadd.f32 %v2325_v50, %v5226_v46  ;;  %v2438_v56 = vpop.f32.mrb[115].mxu1  ;;  %v4457_v42 = vpop.eup %4456  ;;  %4474 = vtanh.f32 %v2324_v48  ;;  %3873 = vmatpush1.bf16.msra.mxu1 %v3872_v33 }
 0x428   : > { %v2439_v59 = vadd.f32 %v2438_v56, %v5226_v46  ;;  %v4459_v60 = vpop.eup %4458  ;;  %4476 = vtanh.f32 %v2437_v52  ;;  %v2329_v61 = vpop.f32.mrb[116].mxu0 }
 0x429   : > { %v4461_v63 = vpop.eup %4460  ;;  %4478 = vtanh.f32 %v2326_v53  ;;  %v2330_v1 = vadd.f32 %v2329_v61, %v5232_v54  ;;  %v2442_v3 = vpop.f32.mrb[116].mxu1  ;;  %v3860_v4 = vpack.c.bf16 %v4459_v60, %v4451_v41  ;;  %v5677_v60 = vld [vmem:[%s5910_s3 + $0x8] sm:$0xff] }
 0x42a   : > { %v2331_v10 = vpop.f32.mrb[117].mxu0  ;;  %v4463_v5 = vpop.eup %4462  ;;  %4480 = vtanh.f32 %v2439_v59  ;;  %v2443_v45 = vadd.f32 %v2442_v3, %v5232_v54  ;;  %v3876_v12 = vpack.c.bf16 %v4461_v63, %v4453_v47 }
 0x42b   : > { %v2332_v7 = vadd.f32 %v2331_v10, %v5232_v54  ;;  %v2444_v58 = vpop.f32.mrb[117].mxu1  ;;  %v4465_v40 = vpop.eup %4464  ;;  %4482 = vtanh.f32 %v2330_v1  ;;  %v3858_v8 = vpack.c.bf16 %v4463_v5, %v4455_v51 }
 0x42c   : > { %v2445_v55 = vadd.f32 %v2444_v58, %v5232_v54  ;;  %4484 = vtanh.f32 %v2443_v45  ;;  %v2335_v22 = vpop.f32.mrb[118].mxu0  ;;  %v3874_v62 = vpack.c.bf16 %v4465_v40, %v4457_v42 }
 0x42d   : > { %v5649_v17 = vpop.eup %4466  ;;  %4486 = vtanh.f32 %v2332_v7  ;;  %v2336_v18 = vadd.f32 %v2335_v22, %v5238_v2  ;;  %v2448_v19 = vpop.f32.mrb[118].mxu1  ;;  %3859 = vmatprep.subr.bf16.mxu0 %v3858_v8 }
 0x42e   : > { %v2337_v24 = vpop.f32.mrb[119].mxu0  ;;  %v4469_v20 = vpop.eup %4468  ;;  %4488 = vtanh.f32 %v2445_v55  ;;  %v2449_v21 = vadd.f32 %v2448_v19, %v5238_v2  ;;  %3875 = vmatprep.subr.bf16.mxu1 %v3874_v62  ;;  %3861 = vmatpush1.bf16.msra.mxu0 %v3860_v4 }
 0x42f   : > { %v2338_v23 = vadd.f32 %v2337_v24, %v5238_v2  ;;  %v2450_v26 = vpop.f32.mrb[119].mxu1  ;;  %v4471_v27 = vpop.eup %4470  ;;  %4490 = vtanh.f32 %v2336_v18  ;;  %3877 = vmatpush1.bf16.msra.mxu1 %v3876_v12 }
 0x430   : > { %v2451_v28 = vadd.f32 %v2450_v26, %v5238_v2  ;;  %v4473_v13 = vpop.eup %4472  ;;  %4492 = vtanh.f32 %v2449_v21  ;;  %v2341_v14 = vpop.f32.mrb[120].mxu0 }
 0x431   : > { %v4475_v30 = vpop.eup %4474  ;;  %4494 = vtanh.f32 %v2338_v23  ;;  %v2342_v31 = vadd.f32 %v2341_v14, %v5244_v16  ;;  %v2454_v32 = vpop.f32.mrb[120].mxu1  ;;  %3612 = vmatmul.mubr.msk.f32.vlgmr.msra.gmra.mrb[128].mxu0 %vm968_vm2, %v5659_v38 }
 0x432   : > { %v2343_v33 = vpop.f32.mrb[121].mxu0  ;;  %v4477_v39 = vpop.eup %4476  ;;  %4496 = vtanh.f32 %v2451_v28  ;;  %v2455_v35 = vadd.f32 %v2454_v32, %v5244_v16  ;;  %3620 = vmatmul.mubr.msk.f32.vlgmr.msra.gmra.mrb[128].mxu1 %vm968_vm2, %v5659_v38  ;;  %2611 = vmatprep.mubr.f32.mxu0 %v4732_v0  ;;  %v3880_v43 = vpack.c.bf16 %v4475_v30, %v5649_v17 }
 0x433   : > { %v2344_v41 = vadd.f32 %v2343_v33, %v5244_v16  ;;  %v2456_v25 = vpop.f32.mrb[121].mxu1  ;;  %v4479_v47 = vpop.eup %4478  ;;  %4498 = vtanh.f32 %v2342_v31  ;;  %2724 = vmatprep.mubr.f32.mxu1 %v4732_v0  ;;  %v3896_v49 = vpack.c.bf16 %v4477_v39, %v4469_v20 }
 0x434   : > { %v2457_v48 = vadd.f32 %v2456_v25, %v5244_v16  ;;  %v4481_v50 = vpop.eup %4480  ;;  %4500 = vtanh.f32 %v2455_v35  ;;  %v2347_v51 = vpop.f32.mrb[122].mxu0  ;;  %v3878_v52 = vpack.c.bf16 %v4479_v47, %v4471_v27 }
 0x435   : > { %v5671_v53 = vpop.eup %4482  ;;  %4502 = vtanh.f32 %v2344_v41  ;;  %v2348_v56 = vadd.f32 %v2347_v51, %v5250_v36  ;;  %v2460_v42 = vpop.f32.mrb[122].mxu1  ;;  %3613 = vmatmul.mubr.msk.f32.gmra.mrb[130].mxu0 %vm968_vm2, %v5677_v60  ;;  %v3894_v61 = vpack.c.bf16 %v4481_v50, %v4473_v13 }
 0x436   : > { %v2349_v59 = vpop.f32.mrb[123].mxu0  ;;  %v4485_v63 = vpop.eup %4484  ;;  %4504 = vtanh.f32 %v2457_v48  ;;  %v2461_v1 = vadd.f32 %v2460_v42, %v5250_v36  ;;  %3621 = vmatmul.mubr.msk.f32.gmra.mrb[130].mxu1 %vm968_vm2, %v5677_v60  ;;  %3879 = vmatprep.subr.bf16.mxu0 %v3878_v52 }
 0x437   : > { %v2350_v3 = vadd.f32 %v2349_v59, %v5250_v36  ;;  %v2462_v10 = vpop.f32.mrb[123].mxu1  ;;  %v4487_v4 = vpop.eup %4486  ;;  %4506 = vtanh.f32 %v2348_v56  ;;  %3895 = vmatprep.subr.bf16.mxu1 %v3894_v61  ;;  %3881 = vmatpush1.bf16.msra.mxu0 %v3880_v43 }
 0x438   : > { %v2463_v5 = vadd.f32 %v2462_v10, %v5250_v36  ;;  %v4489_v45 = vpop.eup %4488  ;;  %4508 = vtanh.f32 %v2461_v1  ;;  %3897 = vmatpush1.bf16.msra.mxu1 %v3896_v49  ;;  %v2353_v7 = vpop.f32.mrb[124].mxu0  ;;  %2617 = vmatprep.mubr.f32.mxu0 %v4732_v0 }
 0x439   : > { %v4491_v58 = vpop.eup %4490  ;;  %4510 = vtanh.f32 %v2350_v3  ;;  %v2354_v12 = vadd.f32 %v2353_v7, %v5256_v44  ;;  %v2466_v40 = vpop.f32.mrb[124].mxu1  ;;  %2730 = vmatprep.mubr.f32.mxu1 %v4732_v0  ;;  %3614 = vmatmul.mubr.msk.f32.gmra.mrb[132].mxu0 %vm968_vm2, %v5485_v37 }
 0x43a   : > { %v2355_v55 = vpop.f32.mrb[125].mxu0  ;;  %v4493_v8 = vpop.eup %4492  ;;  %4512 = vtanh.f32 %v2463_v5  ;;  %v2467_v22 = vadd.f32 %v2466_v40, %v5256_v44  ;;  %3622 = vmatmul.mubr.msk.f32.gmra.mrb[132].mxu1 %vm968_vm2, %v5485_v37  ;;  %2623 = vmatprep.mubr.f32.mxu0 %v4732_v0  ;;  %v3884_v18 = vpack.c.bf16 %v4491_v58, %v5671_v53 }
 0x43b   : > { %v2356_v62 = vadd.f32 %v2355_v55, %v5256_v44  ;;  %v2468_v17 = vpop.f32.mrb[125].mxu1  ;;  %v4495_v19 = vpop.eup %4494  ;;  %4514 = vtanh.f32 %v2354_v12  ;;  %2736 = vmatprep.mubr.f32.mxu1 %v4732_v0  ;;  %v3900_v20 = vpack.c.bf16 %v4493_v8, %v4485_v63 }
 0x43c   : > { %v2469_v24 = vadd.f32 %v2468_v17, %v5256_v44  ;;  %v4497_v21 = vpop.eup %4496  ;;  %4516 = vtanh.f32 %v2467_v22  ;;  %v2359_v23 = vpop.f32.mrb[126].mxu0  ;;  %v3882_v26 = vpack.c.bf16 %v4495_v19, %v4487_v4 }
 0x43d   : > { %v4499_v27 = vpop.eup %4498  ;;  %4518 = vtanh.f32 %v2356_v62  ;;  %v2360_v28 = vadd.f32 %v2359_v23, %v5262_v9  ;;  %v2472_v13 = vpop.f32.mrb[126].mxu1  ;;  %3615 = vmatmul.mubr.msk.f32.gmra.mrb[134].mxu0 %vm968_vm2, %v5502_v57  ;;  %v3898_v30 = vpack.c.bf16 %v4497_v21, %v4489_v45 }
 0x43e   : > { %v2361_v14 = vpop.f32.mrb[127].mxu0  ;;  %v4501_v31 = vpop.eup %4500  ;;  %4520 = vtanh.f32 %v2469_v24  ;;  %v2473_v32 = vadd.f32 %v2472_v13, %v5262_v9  ;;  %3623 = vmatmul.mubr.msk.f32.gmra.mrb[134].mxu1 %vm968_vm2, %v5502_v57  ;;  %3883 = vmatprep.subr.bf16.mxu0 %v3882_v26 }
 0x43f   : > { %v2362_v33 = vadd.f32 %v2361_v14, %v5262_v9  ;;  %v2474_v39 = vpop.f32.mrb[127].mxu1  ;;  %v4503_v35 = vpop.eup %4502  ;;  %4522 = vtanh.f32 %v2360_v28  ;;  %3899 = vmatprep.subr.bf16.mxu1 %v3898_v30  ;;  %3885 = vmatpush1.bf16.msra.mxu0 %v3884_v18 }
 0x440   : > { %v2475_v41 = vadd.f32 %v2474_v39, %v5262_v9  ;;  %v4505_v25 = vpop.eup %4504  ;;  %4524 = vtanh.f32 %v2473_v32  ;;  %3901 = vmatpush1.bf16.msra.mxu1 %v3900_v20  ;;  %2629 = vmatprep.mubr.f32.mxu0 %v4732_v0 }
 0x441   : > { %v4507_v43 = vpop.eup %4506  ;;  %4526 = vtanh.f32 %v2362_v33  ;;  %2742 = vmatprep.mubr.f32.mxu1 %v4732_v0  ;;  %3616 = vmatmul.mubr.msk.f32.gmra.mrb[136].mxu0 %vm968_vm2, %v5516_v6 }
 0x442   : > { %v4509_v47 = vpop.eup %4508  ;;  %4528 = vtanh.f32 %v2475_v41  ;;  %3624 = vmatmul.mubr.msk.f32.gmra.mrb[136].mxu1 %vm968_vm2, %v5516_v6  ;;  %2635 = vmatprep.mubr.f32.mxu0 %v4732_v0  ;;  %v3888_v48 = vpack.c.bf16 %v4507_v43, %v4499_v27 }
 0x443   : > { %v4511_v49 = vpop.eup %4510  ;;  %2748 = vmatprep.mubr.f32.mxu1 %v4732_v0  ;;  %v3904_v50 = vpack.c.bf16 %v4509_v47, %v4501_v31 }
 0x444   : > { %v4513_v51 = vpop.eup %4512  ;;  %v3886_v52 = vpack.c.bf16 %v4511_v49, %v4503_v35 }
 0x445   : > { %v4515_v53 = vpop.eup %4514  ;;  %3617 = vmatmul.mubr.msk.f32.gmra.mrb[138].mxu0 %vm968_vm2, %v5527_v15  ;;  %v3902_v56 = vpack.c.bf16 %v4513_v51, %v4505_v25 }
 0x446   : > { %v4517_v42 = vpop.eup %4516  ;;  %3625 = vmatmul.mubr.msk.f32.gmra.mrb[138].mxu1 %vm968_vm2, %v5527_v15  ;;  %3887 = vmatprep.subr.bf16.mxu0 %v3886_v52 }
 0x447   : > { %v4519_v59 = vpop.eup %4518  ;;  %3903 = vmatprep.subr.bf16.mxu1 %v3902_v56  ;;  %3889 = vmatpush1.bf16.msra.mxu0 %v3888_v48 }
 0x448   : > { %v4521_v61 = vpop.eup %4520  ;;  %3905 = vmatpush1.bf16.msra.mxu1 %v3904_v50  ;;  %2641 = vmatprep.mubr.f32.mxu0 %v4732_v0 }
 0x449   : > { %v4523_v63 = vpop.eup %4522  ;;  %2754 = vmatprep.mubr.f32.mxu1 %v4732_v0  ;;  %3618 = vmatmul.mubr.msk.f32.gmra.mrb[140].mxu0 %vm968_vm2, %v5538_v29 }
 0x44a   : > { %v4525_v1 = vpop.eup %4524  ;;  %3626 = vmatmul.mubr.msk.f32.gmra.mrb[140].mxu1 %vm968_vm2, %v5538_v29  ;;  %2647 = vmatprep.mubr.f32.mxu0 %v4732_v0  ;;  %v3892_v3 = vpack.c.bf16 %v4523_v63, %v4515_v53 }
 0x44b   : > { %v4527_v10 = vpop.eup %4526  ;;  %2760 = vmatprep.mubr.f32.mxu1 %v4732_v0  ;;  %v3908_v4 = vpack.c.bf16 %v4525_v1, %v4517_v42 }
 0x44c   : > { %v4529_v5 = vpop.eup %4528  ;;  %v3890_v45 = vpack.c.bf16 %v4527_v10, %v4519_v59 }
 0x44d   : > { %3619 = vmatmul.mubr.msk.f32.gmra.mrb[142].mxu0 %vm968_vm2, %v5549_v11  ;;  %v3906_v7 = vpack.c.bf16 %v4529_v5, %v4521_v61 }
 0x44e   : > { %3627 = vmatmul.mubr.msk.f32.gmra.mrb[142].mxu1 %vm968_vm2, %v5549_v11  ;;  %3891 = vmatprep.subr.bf16.mxu0 %v3890_v45 }
 0x44f   : > { %3907 = vmatprep.subr.bf16.mxu1 %v3906_v7  ;;  %3893 = vmatpush1.bf16.msra.mxu0 %v3892_v3 }
 0x450   : > { %3909 = vmatpush1.bf16.msra.mxu1 %v3908_v4  ;;  %2831 = vmatprep.mubr.f32.mxu0 %v4732_v0 }
 0x451   : > { %2944 = vmatprep.mubr.f32.mxu1 %v4732_v0 }
 0x452   : > { %3628 = vmatmul.mubr.msk.f32.vlgmr.msra.gmra.mrb[144].mxu0 %vm968_vm2, %v5659_v38 }
 0x453   : > { %3636 = vmatmul.mubr.msk.f32.vlgmr.msra.gmra.mrb[144].mxu1 %vm968_vm2, %v5659_v38  ;;  %2837 = vmatprep.mubr.f32.mxu0 %v4732_v0 }
 0x454   : > { %2950 = vmatprep.mubr.f32.mxu1 %v4732_v0 }
 0x456   : > { %3629 = vmatmul.mubr.msk.f32.gmra.mrb[146].mxu0 %vm968_vm2, %v5677_v60 }
 0x457   : > { %3637 = vmatmul.mubr.msk.f32.gmra.mrb[146].mxu1 %vm968_vm2, %v5677_v60  ;;  %2843 = vmatprep.mubr.f32.mxu0 %v4732_v0 }
 0x458   : > { %2956 = vmatprep.mubr.f32.mxu1 %v4732_v0 }
 0x45a   : > { %3630 = vmatmul.mubr.msk.f32.gmra.mrb[148].mxu0 %vm968_vm2, %v5485_v37 }
 0x45b   : > { %3638 = vmatmul.mubr.msk.f32.gmra.mrb[148].mxu1 %vm968_vm2, %v5485_v37  ;;  %2849 = vmatprep.mubr.f32.mxu0 %v4732_v0 }
 0x45c   : > { %2962 = vmatprep.mubr.f32.mxu1 %v4732_v0 }
 0x45e   : > { %3631 = vmatmul.mubr.msk.f32.gmra.mrb[150].mxu0 %vm968_vm2, %v5502_v57 }
 0x45f   : > { %3639 = vmatmul.mubr.msk.f32.gmra.mrb[150].mxu1 %vm968_vm2, %v5502_v57  ;;  %2855 = vmatprep.mubr.f32.mxu0 %v4732_v0 }
 0x460   : > { %2968 = vmatprep.mubr.f32.mxu1 %v4732_v0 }
 0x462   : > { %3632 = vmatmul.mubr.msk.f32.gmra.mrb[152].mxu0 %vm968_vm2, %v5516_v6 }
 0x463   : > { %3640 = vmatmul.mubr.msk.f32.gmra.mrb[152].mxu1 %vm968_vm2, %v5516_v6  ;;  %2861 = vmatprep.mubr.f32.mxu0 %v4732_v0 }
 0x464   : > { %2974 = vmatprep.mubr.f32.mxu1 %v4732_v0 }
 0x466   : > { %3633 = vmatmul.mubr.msk.f32.gmra.mrb[154].mxu0 %vm968_vm2, %v5527_v15 }
 0x467   : > { %3641 = vmatmul.mubr.msk.f32.gmra.mrb[154].mxu1 %vm968_vm2, %v5527_v15  ;;  %2867 = vmatprep.mubr.f32.mxu0 %v4732_v0 }
 0x468   : > { %2980 = vmatprep.mubr.f32.mxu1 %v4732_v0 }
 0x46a   : > { %3634 = vmatmul.mubr.msk.f32.gmra.mrb[156].mxu0 %vm968_vm2, %v5538_v29 }
 0x46b   : > { %3642 = vmatmul.mubr.msk.f32.gmra.mrb[156].mxu1 %vm968_vm2, %v5538_v29  ;;  %2873 = vmatprep.mubr.f32.mxu0 %v4732_v0 }
 0x46c   : > { %2986 = vmatprep.mubr.f32.mxu1 %v4732_v0 }
 0x46e   : > { %3635 = vmatmul.mubr.msk.f32.gmra.mrb[158].mxu0 %vm968_vm2, %v5549_v11 }
 0x46f   : > { %3643 = vmatmul.mubr.msk.f32.gmra.mrb[158].mxu1 %vm968_vm2, %v5549_v11  ;;  %3129 = vmatprep.mubr.f32.mxu0 %v4732_v0 }
 0x470   : > { %3200 = vmatprep.mubr.f32.mxu1 %v4732_v0 }
 0x504   : > { %v2607_v37 = vpop.f32.mrb[128].mxu0 }
 0x505   : > { %v2608_v57 = vadd.f32 %v2607_v37, %v5220_v34  ;;  %v2720_v6 = vpop.f32.mrb[128].mxu1  ;;  %v2609_v15 = vpop.f32.mrb[129].mxu0 }
 0x506   : > { %v2721_v29 = vadd.f32 %v2720_v6, %v5220_v34  ;;  %v2610_v38 = vadd.f32 %v2609_v15, %v5220_v34  ;;  %v2722_v60 = vpop.f32.mrb[129].mxu1 }
 0x507   : > { %4530 = vtanh.f32 %v2608_v57  ;;  %v2723_v58 = vadd.f32 %v2722_v60, %v5220_v34 }
 0x508   : > { %4532 = vtanh.f32 %v2721_v29  ;;  %v2613_v12 = vpop.f32.mrb[130].mxu0 }
 0x509   : > { %4534 = vtanh.f32 %v2610_v38  ;;  %v2614_v11 = vadd.f32 %v2613_v12, %v5226_v46  ;;  %v2726_v40 = vpop.f32.mrb[130].mxu1  ;;  %v2615_v55 = vpop.f32.mrb[131].mxu0 }
 0x50a   : > { %4536 = vtanh.f32 %v2723_v58  ;;  %v2727_v8 = vadd.f32 %v2726_v40, %v5226_v46  ;;  %v2616_v22 = vadd.f32 %v2615_v55, %v5226_v46  ;;  %v2728_v62 = vpop.f32.mrb[131].mxu1 }
 0x50b   : > { %4538 = vtanh.f32 %v2614_v11  ;;  %v2729_v17 = vadd.f32 %v2728_v62, %v5226_v46 }
 0x50c   : > { %4540 = vtanh.f32 %v2727_v8  ;;  %v2619_v18 = vpop.f32.mrb[132].mxu0 }
 0x50d   : > { %4542 = vtanh.f32 %v2616_v22  ;;  %v2620_v19 = vadd.f32 %v2619_v18, %v5232_v54  ;;  %v2732_v24 = vpop.f32.mrb[132].mxu1  ;;  %v2621_v20 = vpop.f32.mrb[133].mxu0 }
 0x50e   : > { %4544 = vtanh.f32 %v2729_v17  ;;  %v2733_v21 = vadd.f32 %v2732_v24, %v5232_v54  ;;  %v2622_v23 = vadd.f32 %v2621_v20, %v5232_v54  ;;  %v2734_v26 = vpop.f32.mrb[133].mxu1 }
 0x50f   : > { %4546 = vtanh.f32 %v2620_v19  ;;  %v2735_v27 = vadd.f32 %v2734_v26, %v5232_v54 }
 0x510   : > { %4548 = vtanh.f32 %v2733_v21  ;;  %v2625_v28 = vpop.f32.mrb[134].mxu0 }
 0x511   : > { %v4531_v13 = vpop.eup %4530  ;;  %4550 = vtanh.f32 %v2622_v23  ;;  %v2626_v14 = vadd.f32 %v2625_v28, %v5238_v2  ;;  %v2738_v30 = vpop.f32.mrb[134].mxu1 }
 0x512   : > { %v2627_v31 = vpop.f32.mrb[135].mxu0  ;;  %v4533_v32 = vpop.eup %4532  ;;  %4552 = vtanh.f32 %v2735_v27  ;;  %v2739_v33 = vadd.f32 %v2738_v30, %v5238_v2 }
 0x513   : > { %v2628_v39 = vadd.f32 %v2627_v31, %v5238_v2  ;;  %v2740_v35 = vpop.f32.mrb[135].mxu1  ;;  %v4535_v41 = vpop.eup %4534  ;;  %4554 = vtanh.f32 %v2626_v14 }
 0x514   : > { %v2741_v25 = vadd.f32 %v2740_v35, %v5238_v2  ;;  %v4537_v43 = vpop.eup %4536  ;;  %4556 = vtanh.f32 %v2739_v33  ;;  %v2631_v47 = vpop.f32.mrb[136].mxu0 }
 0x515   : > { %v4539_v48 = vpop.eup %4538  ;;  %4558 = vtanh.f32 %v2628_v39  ;;  %v2632_v49 = vadd.f32 %v2631_v47, %v5244_v16  ;;  %v2744_v50 = vpop.f32.mrb[136].mxu1 }
 0x516   : > { %v2633_v51 = vpop.f32.mrb[137].mxu0  ;;  %v4541_v52 = vpop.eup %4540  ;;  %4560 = vtanh.f32 %v2741_v25  ;;  %v2745_v53 = vadd.f32 %v2744_v50, %v5244_v16  ;;  %v3912_v59 = vpack.c.bf16 %v4539_v48, %v4531_v13 }
 0x517   : > { %v2634_v56 = vadd.f32 %v2633_v51, %v5244_v16  ;;  %v2746_v42 = vpop.f32.mrb[137].mxu1  ;;  %v4543_v61 = vpop.eup %4542  ;;  %4562 = vtanh.f32 %v2632_v49  ;;  %v3928_v1 = vpack.c.bf16 %v4541_v52, %v4533_v32 }
 0x518   : > { %v2747_v63 = vadd.f32 %v2746_v42, %v5244_v16  ;;  %v4545_v3 = vpop.eup %4544  ;;  %4564 = vtanh.f32 %v2745_v53  ;;  %v2637_v10 = vpop.f32.mrb[138].mxu0  ;;  %v3910_v4 = vpack.c.bf16 %v4543_v61, %v4535_v41 }
 0x519   : > { %v4547_v5 = vpop.eup %4546  ;;  %4566 = vtanh.f32 %v2634_v56  ;;  %v2638_v45 = vadd.f32 %v2637_v10, %v5250_v36  ;;  %v2750_v7 = vpop.f32.mrb[138].mxu1  ;;  %v3926_v57 = vpack.c.bf16 %v4545_v3, %v4537_v43 }
 0x51a   : > { %v2639_v37 = vpop.f32.mrb[139].mxu0  ;;  %v4549_v6 = vpop.eup %4548  ;;  %4568 = vtanh.f32 %v2747_v63  ;;  %v2751_v15 = vadd.f32 %v2750_v7, %v5250_v36  ;;  %3911 = vmatprep.subr.bf16.mxu0 %v3910_v4 }
 0x51b   : > { %v2640_v29 = vadd.f32 %v2639_v37, %v5250_v36  ;;  %v2752_v38 = vpop.f32.mrb[139].mxu1  ;;  %v4551_v60 = vpop.eup %4550  ;;  %4570 = vtanh.f32 %v2638_v45  ;;  %3927 = vmatprep.subr.bf16.mxu1 %v3926_v57  ;;  %3913 = vmatpush1.bf16.msra.mxu0 %v3912_v59 }
 0x51c   : > { %v2753_v58 = vadd.f32 %v2752_v38, %v5250_v36  ;;  %v4553_v12 = vpop.eup %4552  ;;  %4572 = vtanh.f32 %v2751_v15  ;;  %3929 = vmatpush1.bf16.msra.mxu1 %v3928_v1  ;;  %v2643_v11 = vpop.f32.mrb[140].mxu0 }
 0x51d   : > { %v4555_v40 = vpop.eup %4554  ;;  %4574 = vtanh.f32 %v2640_v29  ;;  %v2644_v55 = vadd.f32 %v2643_v11, %v5256_v44  ;;  %v2756_v8 = vpop.f32.mrb[140].mxu1 }
 0x51e   : > { %v2645_v22 = vpop.f32.mrb[141].mxu0  ;;  %v4557_v62 = vpop.eup %4556  ;;  %4576 = vtanh.f32 %v2753_v58  ;;  %v2757_v17 = vadd.f32 %v2756_v8, %v5256_v44  ;;  %v3916_v24 = vpack.c.bf16 %v4555_v40, %v4547_v5 }
 0x51f   : > { %v2646_v18 = vadd.f32 %v2645_v22, %v5256_v44  ;;  %v2758_v19 = vpop.f32.mrb[141].mxu1  ;;  %v4559_v20 = vpop.eup %4558  ;;  %4578 = vtanh.f32 %v2644_v55  ;;  %v3932_v23 = vpack.c.bf16 %v4557_v62, %v4549_v6 }
 0x520   : > { %v2759_v21 = vadd.f32 %v2758_v19, %v5256_v44  ;;  %v4561_v26 = vpop.eup %4560  ;;  %4580 = vtanh.f32 %v2757_v17  ;;  %v2649_v27 = vpop.f32.mrb[142].mxu0  ;;  %v3914_v28 = vpack.c.bf16 %v4559_v20, %v4551_v60 }
 0x521   : > { %v4563_v13 = vpop.eup %4562  ;;  %4582 = vtanh.f32 %v2646_v18  ;;  %v2650_v14 = vadd.f32 %v2649_v27, %v5262_v9  ;;  %v2762_v30 = vpop.f32.mrb[142].mxu1  ;;  %v3930_v32 = vpack.c.bf16 %v4561_v26, %v4553_v12 }
 0x522   : > { %v2651_v31 = vpop.f32.mrb[143].mxu0  ;;  %v4565_v33 = vpop.eup %4564  ;;  %4584 = vtanh.f32 %v2759_v21  ;;  %v2763_v39 = vadd.f32 %v2762_v30, %v5262_v9  ;;  %3915 = vmatprep.subr.bf16.mxu0 %v3914_v28 }
 0x523   : > { %v2652_v35 = vadd.f32 %v2651_v31, %v5262_v9  ;;  %v2764_v41 = vpop.f32.mrb[143].mxu1  ;;  %v4567_v25 = vpop.eup %4566  ;;  %4586 = vtanh.f32 %v2650_v14  ;;  %3931 = vmatprep.subr.bf16.mxu1 %v3930_v32  ;;  %3917 = vmatpush1.bf16.msra.mxu0 %v3916_v24 }
 0x524   : > { %v2765_v43 = vadd.f32 %v2764_v41, %v5262_v9  ;;  %v4569_v47 = vpop.eup %4568  ;;  %4588 = vtanh.f32 %v2763_v39  ;;  %3933 = vmatpush1.bf16.msra.mxu1 %v3932_v23 }
 0x525   : > { %v4571_v48 = vpop.eup %4570  ;;  %4590 = vtanh.f32 %v2652_v35  ;;  %v2833_v49 = vpop.f32.mrb[144].mxu0 }
 0x526   : > { %v4573_v50 = vpop.eup %4572  ;;  %4592 = vtanh.f32 %v2765_v43  ;;  %v2834_v51 = vadd.f32 %v2833_v49, %v5220_v34  ;;  %v2946_v52 = vpop.f32.mrb[144].mxu1  ;;  %v3920_v56 = vpack.c.bf16 %v4571_v48, %v4563_v13 }
 0x527   : > { %v2835_v53 = vpop.f32.mrb[145].mxu0  ;;  %v4575_v42 = vpop.eup %4574  ;;  %v2947_v59 = vadd.f32 %v2946_v52, %v5220_v34  ;;  %v3936_v1 = vpack.c.bf16 %v4573_v50, %v4565_v33 }
 0x528   : > { %v2836_v61 = vadd.f32 %v2835_v53, %v5220_v34  ;;  %v2948_v63 = vpop.f32.mrb[145].mxu1  ;;  %v4577_v3 = vpop.eup %4576  ;;  %4594 = vtanh.f32 %v2834_v51  ;;  %v3918_v4 = vpack.c.bf16 %v4575_v42, %v4567_v25 }
 0x529   : > { %v2949_v10 = vadd.f32 %v2948_v63, %v5220_v34  ;;  %v4579_v5 = vpop.eup %4578  ;;  %4596 = vtanh.f32 %v2947_v59  ;;  %v2839_v45 = vpop.f32.mrb[146].mxu0  ;;  %v3934_v7 = vpack.c.bf16 %v4577_v3, %v4569_v47 }
 0x52a   : > { %v4581_v37 = vpop.eup %4580  ;;  %4598 = vtanh.f32 %v2836_v61  ;;  %v2840_v57 = vadd.f32 %v2839_v45, %v5226_v46  ;;  %v2952_v6 = vpop.f32.mrb[146].mxu1  ;;  %3919 = vmatprep.subr.bf16.mxu0 %v3918_v4 }
 0x52b   : > { %v2841_v15 = vpop.f32.mrb[147].mxu0  ;;  %v4583_v29 = vpop.eup %4582  ;;  %4600 = vtanh.f32 %v2949_v10  ;;  %v2953_v38 = vadd.f32 %v2952_v6, %v5226_v46  ;;  %3935 = vmatprep.subr.bf16.mxu1 %v3934_v7  ;;  %3921 = vmatpush1.bf16.msra.mxu0 %v3920_v56 }
 0x52c   : > { %v2842_v60 = vadd.f32 %v2841_v15, %v5226_v46  ;;  %v2954_v58 = vpop.f32.mrb[147].mxu1  ;;  %v4585_v34 = vpop.eup %4584  ;;  %4602 = vtanh.f32 %v2840_v57  ;;  %3937 = vmatpush1.bf16.msra.mxu1 %v3936_v1 }
 0x52d   : > { %v2955_v12 = vadd.f32 %v2954_v58, %v5226_v46  ;;  %v4587_v11 = vpop.eup %4586  ;;  %4604 = vtanh.f32 %v2953_v38  ;;  %v2845_v40 = vpop.f32.mrb[148].mxu0 }
 0x52e   : > { %v4589_v55 = vpop.eup %4588  ;;  %4606 = vtanh.f32 %v2842_v60  ;;  %v2846_v8 = vadd.f32 %v2845_v40, %v5232_v54  ;;  %v2958_v22 = vpop.f32.mrb[148].mxu1  ;;  %v3924_v17 = vpack.c.bf16 %v4587_v11, %v4579_v5 }
 0x52f   : > { %v2847_v62 = vpop.f32.mrb[149].mxu0  ;;  %v4591_v18 = vpop.eup %4590  ;;  %4608 = vtanh.f32 %v2955_v12  ;;  %v2959_v19 = vadd.f32 %v2958_v22, %v5232_v54  ;;  %v3940_v21 = vpack.c.bf16 %v4589_v55, %v4581_v37 }
 0x530   : > { %v2848_v24 = vadd.f32 %v2847_v62, %v5232_v54  ;;  %v2960_v20 = vpop.f32.mrb[149].mxu1  ;;  %v4593_v46 = vpop.eup %4592  ;;  %4610 = vtanh.f32 %v2846_v8  ;;  %v3922_v26 = vpack.c.bf16 %v4591_v18, %v4583_v29 }
 0x531   : > { %v2961_v23 = vadd.f32 %v2960_v20, %v5232_v54  ;;  %4612 = vtanh.f32 %v2959_v19  ;;  %v2851_v27 = vpop.f32.mrb[150].mxu0  ;;  %v3938_v28 = vpack.c.bf16 %v4593_v46, %v4585_v34  ;;  %v5831_v54 = vld [vmem:[%s5912_s5] sm:$0x3] }
 0x532   : > { %v4595_v13 = vpop.eup %4594  ;;  %4614 = vtanh.f32 %v2848_v24  ;;  %v2852_v14 = vadd.f32 %v2851_v27, %v5238_v2  ;;  %v2964_v30 = vpop.f32.mrb[150].mxu1  ;;  %3923 = vmatprep.subr.bf16.mxu0 %v3922_v26 }
 0x533   : > { %v2853_v31 = vpop.f32.mrb[151].mxu0  ;;  %v4597_v32 = vpop.eup %4596  ;;  %4616 = vtanh.f32 %v2961_v23  ;;  %v2965_v33 = vadd.f32 %v2964_v30, %v5238_v2  ;;  %3939 = vmatprep.subr.bf16.mxu1 %v3938_v28  ;;  %3925 = vmatpush1.bf16.msra.mxu0 %v3924_v17 }
 0x534   : > { %v2854_v39 = vadd.f32 %v2853_v31, %v5238_v2  ;;  %v2966_v35 = vpop.f32.mrb[151].mxu1  ;;  %v4599_v41 = vpop.eup %4598  ;;  %4618 = vtanh.f32 %v2852_v14  ;;  %3941 = vmatpush1.bf16.msra.mxu1 %v3940_v21 }
 0x535   : > { %v2967_v25 = vadd.f32 %v2966_v35, %v5238_v2  ;;  %v4601_v43 = vpop.eup %4600  ;;  %4620 = vtanh.f32 %v2965_v33  ;;  %v2857_v47 = vpop.f32.mrb[152].mxu0 }
 0x536   : > { %v4603_v48 = vpop.eup %4602  ;;  %4622 = vtanh.f32 %v2854_v39  ;;  %v2858_v49 = vadd.f32 %v2857_v47, %v5244_v16  ;;  %v2970_v50 = vpop.f32.mrb[152].mxu1  ;;  %3644 = vmatmul.mubr.msk.f32.vlgmr.msra.gmra.mrb[160].mxu0 %vm968_vm2, %v5831_v54 }
 0x537   : > { %v2859_v51 = vpop.f32.mrb[153].mxu0  ;;  %v4605_v52 = vpop.eup %4604  ;;  %4624 = vtanh.f32 %v2967_v25  ;;  %v2971_v53 = vadd.f32 %v2970_v50, %v5244_v16  ;;  %3645 = vmatmul.mubr.msk.f32.vlgmr.msra.gmra.mrb[160].mxu1 %vm968_vm2, %v5831_v54  ;;  %v3944_v42 = vpack.c.bf16 %v4603_v48, %v4595_v13  ;;  %3271 = vmatprep.mubr.f32.mxu0 %v4732_v0 }
 0x538   : > { %v2860_v56 = vadd.f32 %v2859_v51, %v5244_v16  ;;  %v2972_v2 = vpop.f32.mrb[153].mxu1  ;;  %v4607_v59 = vpop.eup %4606  ;;  %4626 = vtanh.f32 %v2858_v49  ;;  %v3960_v63 = vpack.c.bf16 %v4605_v52, %v4597_v32  ;;  %3342 = vmatprep.mubr.f32.mxu1 %v4732_v0 }
 0x539   : > { %v2973_v61 = vadd.f32 %v2972_v2, %v5244_v16  ;;  %v4609_v1 = vpop.eup %4608  ;;  %4628 = vtanh.f32 %v2971_v53  ;;  %v2863_v3 = vpop.f32.mrb[154].mxu0  ;;  %v3942_v10 = vpack.c.bf16 %v4607_v59, %v4599_v41 }
 0x53a   : > { %v4611_v4 = vpop.eup %4610  ;;  %4630 = vtanh.f32 %v2860_v56  ;;  %v2864_v5 = vadd.f32 %v2863_v3, %v5250_v36  ;;  %v2976_v45 = vpop.f32.mrb[154].mxu1  ;;  %v3958_v37 = vpack.c.bf16 %v4609_v1, %v4601_v43  ;;  %v4734_v1 = vmov 1983009808  }
 0x53b   : > { %v2865_v7 = vpop.f32.mrb[155].mxu0  ;;  %v4613_v57 = vpop.eup %4612  ;;  %4632 = vtanh.f32 %v2973_v61  ;;  %v2977_v6 = vadd.f32 %v2976_v45, %v5250_v36  ;;  %3943 = vmatprep.subr.bf16.mxu0 %v3942_v10  ;;  %v3360_v3 = vunpack.c.l.s4 %v4734_v1  ;;  %v3362_v10 = vlaneseq }
 0x53c   : > { %v2866_v16 = vadd.f32 %v2865_v7, %v5250_v36  ;;  %v2978_v15 = vpop.f32.mrb[155].mxu1  ;;  %v4615_v0 = vpop.eup %4614  ;;  %4634 = vtanh.f32 %v2864_v5  ;;  %3959 = vmatprep.subr.bf16.mxu1 %v3958_v37  ;;  %3945 = vmatpush1.bf16.msra.mxu0 %v3944_v42 }
 0x53d   : > { %v2979_v29 = vadd.f32 %v2978_v15, %v5250_v36  ;;  %v4617_v38 = vpop.eup %4616  ;;  %4636 = vtanh.f32 %v2977_v6  ;;  %3961 = vmatpush1.bf16.msra.mxu1 %v3960_v63  ;;  %v2869_v60 = vpop.f32.mrb[156].mxu0  ;;  %v3363_v5 = vshrl.u32 %v3362_v10, 7 }
 0x53e   : > { %v4619_v58 = vpop.eup %4618  ;;  %4638 = vtanh.f32 %v2866_v16  ;;  %v2870_v34 = vadd.f32 %v2869_v60, %v5256_v44  ;;  %v2982_v12 = vpop.f32.mrb[156].mxu1 }
 0x53f   : > { %v2871_v11 = vpop.f32.mrb[157].mxu0  ;;  %v4621_v40 = vpop.eup %4620  ;;  %4640 = vtanh.f32 %v2979_v29  ;;  %v2983_v55 = vadd.f32 %v2982_v12, %v5256_v44  ;;  %v3948_v36 = vpack.c.bf16 %v4619_v58, %v4611_v4  ;;  %v3361_v4 = vunpack.c.0.s8 %v3360_v3 }
 0x540   : > { %v2872_v8 = vadd.f32 %v2871_v11, %v5256_v44  ;;  %v2984_v22 = vpop.f32.mrb[157].mxu1  ;;  %v4623_v62 = vpop.eup %4622  ;;  %4642 = vtanh.f32 %v2870_v34  ;;  %v3964_v18 = vpack.c.bf16 %v4621_v40, %v4613_v57 }
 0x541   : > { %v2985_v17 = vadd.f32 %v2984_v22, %v5256_v44  ;;  %v4625_v19 = vpop.eup %4624  ;;  %4644 = vtanh.f32 %v2983_v55  ;;  %v2875_v24 = vpop.f32.mrb[158].mxu0  ;;  %v3946_v20 = vpack.c.bf16 %v4623_v62, %v4615_v0  ;;  %v3364_v0 = vsub.s32 %v3361_v4, %v3363_v5 }
 0x542   : > { %v4627_v21 = vpop.eup %4626  ;;  %4646 = vtanh.f32 %v2872_v8  ;;  %v2876_v46 = vadd.f32 %v2875_v24, %v5262_v9  ;;  %v2988_v23 = vpop.f32.mrb[158].mxu1  ;;  %v3962_v27 = vpack.c.bf16 %v4625_v19, %v4617_v38 }
 0x543   : > { %v2877_v26 = vpop.f32.mrb[159].mxu0  ;;  %v4629_v28 = vpop.eup %4628  ;;  %4648 = vtanh.f32 %v2985_v17  ;;  %v2989_v13 = vadd.f32 %v2988_v23, %v5262_v9  ;;  %3947 = vmatprep.subr.bf16.mxu0 %v3946_v20 }
 0x544   : > { %v2878_v14 = vadd.f32 %v2877_v26, %v5262_v9  ;;  %v2990_v30 = vpop.f32.mrb[159].mxu1  ;;  %v4631_v44 = vpop.eup %4630  ;;  %4650 = vtanh.f32 %v2876_v46  ;;  %3963 = vmatprep.subr.bf16.mxu1 %v3962_v27  ;;  %3949 = vmatpush1.bf16.msra.mxu0 %v3948_v36 }
 0x545   : > { %v2991_v31 = vadd.f32 %v2990_v30, %v5262_v9  ;;  %v4633_v32 = vpop.eup %4632  ;;  %4652 = vtanh.f32 %v2989_v13  ;;  %3965 = vmatpush1.bf16.msra.mxu1 %v3964_v18  ;;  %v3060_v45 = vpop.permute.xlu0 %3059 }
 0x546   : > { %v4635_v33 = vpop.eup %4634  ;;  %4654 = vtanh.f32 %v2878_v14 }
 0x547   : > { %v4637_v39 = vpop.eup %4636  ;;  %4656 = vtanh.f32 %v2991_v31  ;;  %v3952_v35 = vpack.c.bf16 %v4635_v33, %v4627_v21 }
 0x548   : > { %v4639_v41 = vpop.eup %4638  ;;  %v3968_v25 = vpack.c.bf16 %v4637_v39, %v4629_v28 }
 0x549   : > { %v4641_v43 = vpop.eup %4640  ;;  %v3950_v47 = vpack.c.bf16 %v4639_v41, %v4631_v44 }
 0x54a   : > { %v4643_v48 = vpop.eup %4642  ;;  %v3966_v49 = vpack.c.bf16 %v4641_v43, %v4633_v32 }
 0x54b   : > { %v4645_v50 = vpop.eup %4644  ;;  %3951 = vmatprep.subr.bf16.mxu0 %v3950_v47 }
 0x54c   : > { %v4647_v51 = vpop.eup %4646  ;;  %3967 = vmatprep.subr.bf16.mxu1 %v3966_v49  ;;  %3953 = vmatpush1.bf16.msra.mxu0 %v3952_v35 }
 0x54d   : > { %v4649_v9 = vpop.eup %4648  ;;  %3969 = vmatpush1.bf16.msra.mxu1 %v3968_v25 }
 0x54e   : > { %v4651_v52 = vpop.eup %4650 }
 0x54f   : > { %v4653_v53 = vpop.eup %4652  ;;  %v3956_v56 = vpack.c.bf16 %v4651_v52, %v4643_v48 }
 0x550   : > { %v4655_v2 = vpop.eup %4654  ;;  %v3972_v42 = vpack.c.bf16 %v4653_v53, %v4645_v50 }
 0x551   : > { %v4657_v59 = vpop.eup %4656  ;;  %v3954_v61 = vpack.c.bf16 %v4655_v2, %v4647_v51 }
 0x552   : > { %v3970_v63 = vpack.c.bf16 %v4657_v59, %v4649_v9 }
 0x553   : > { %3955 = vmatprep.subr.bf16.mxu0 %v3954_v61 }
 0x554   : > { %3971 = vmatprep.subr.bf16.mxu1 %v3970_v63  ;;  %3957 = vmatpush1.bf16.msra.mxu0 %v3956_v56 }
 0x555   : > { %3973 = vmatpush1.bf16.msra.mxu1 %v3972_v42 }
 0x557   : > { %3646 = vmatmul.mubr.msk.f32.vlgmr.msra.gmra.mrb[162].mxu0 %vm968_vm2, %v5831_v54 }
 0x558   : > { %3647 = vmatmul.mubr.msk.f32.vlgmr.msra.gmra.mrb[162].mxu1 %vm968_vm2, %v5831_v54 }
 0x609   : > { %v3131_v7 = vpop.f32.mrb[160].mxu0 }
 0x60a   : > { %v3132_v37 = vadd.f32 %v3131_v7, %v3060_v45  ;;  %v3202_v57 = vpop.f32.mrb[160].mxu1  ;;  %v3133_v6 = vpop.f32.mrb[161].mxu0 }
 0x60b   : > { %v3203_v16 = vadd.f32 %v3202_v57, %v3060_v45  ;;  %v3134_v15 = vadd.f32 %v3133_v6, %v3060_v45  ;;  %v3204_v29 = vpop.f32.mrb[161].mxu1 }
 0x60c   : > { %v3205_v38 = vadd.f32 %v3204_v29, %v3060_v45 }
 0x60d   : > { %v3357_v60 = vcombine.low %v3132_v37, %v3134_v15 }
 0x60e   : > { %v3358_v58 = vcombine.low %v3203_v16, %v3205_v38 }
 0x60f   : > { %v3365_v54 = vrot.slane %v3357_v60, %v3364_v0 }
 0x610   : > { %v3372_v34 = vrot.slane %v3358_v58, %v3364_v0 }
 0x612   : > { %v3373_v12 = vcombine.low %v3365_v54, %v3372_v34 }
 0x614   : > { %3393 = vst [vmem:[%s272_s29] sm:$0xff] %v3373_v12 }
 0x62a   : > { %v3273_v11 = vpop.f32.mrb[162].mxu0 }
 0x62b   : > { %v3274_v40 = vadd.f32 %v3273_v11, %v3060_v45  ;;  %v3344_v55 = vpop.f32.mrb[162].mxu1  ;;  %v3275_v8 = vpop.f32.mrb[163].mxu0 }
 0x62c   : > { %v3345_v22 = vadd.f32 %v3344_v55, %v3060_v45  ;;  %v3276_v36 = vadd.f32 %v3275_v8, %v3060_v45  ;;  %v3346_v62 = vpop.f32.mrb[163].mxu1 }
 0x62d   : > { %v3347_v17 = vadd.f32 %v3346_v62, %v3060_v45 }
 0x62e   : > { %v3374_v18 = vcombine.low %v3274_v40, %v3276_v36 }
 0x62f   : > { %v3375_v19 = vcombine.low %v3345_v22, %v3347_v17 }
 0x630   : > { %v3382_v24 = vrot.slane %v3374_v18, %v3364_v0 }
 0x631   : > { %v3389_v20 = vrot.slane %v3375_v19, %v3364_v0 }
 0x633   : > { %v3390_v21 = vcombine.low %v3382_v24, %v3389_v20 }
 0x635   : > { %3394 = vst [vmem:[%s272_s29 + $0x8] sm:$0xff] %v3390_v21 }
 0x636   : > { %4681 = shalt.err (!%p4678_p3)
}
 0x637   : > { %s4682_s20 = scalar_lea.hbm %s5865_s15, 256  ;;  %s4686_s23 = scalar_lea.hbm %s5914_s7, 512 }
 0x638   : > { %p4683_p4 = scmp.ne.s32.totalorder %s5865_s15, %s4682_s20  ;;  %p4687_p9 = scmp.lt.u32.totalorder %s5865_s15, %s5914_s7 }
 0x639   : > { %p4688_p10 = scmp.lt.u32.totalorder %s4686_s23, %s4682_s20  ;;  %p4690_p12 = scmp.lt.u32.totalorder %s4682_s20, %s5865_s15 }
 0x63a   : > { %p4684_p7 = pnand %p4683_p4, %p4814_p5 }
 0x63b   : > { %p4689_p11 = por %p4688_p10, %p4687_p9 }
 0x63c   : > { %p4685_p8 = pneg %p4684_p7 }
 0x63d   : > { %p4691_p13 = por %p4690_p12, %p4689_p11 }
 0x63f   : > { %p4692_p0 = pnand %p4691_p13, %p4685_p8 }
 0x641   : > { %4695 = shalt.err (!%p4692_p0)
}
 0x642   : > { %3974 = dma.vmem_to_hbm [thread:$0]  (%p4814_p5), %s5867_s9, 256, %s5865_s15, %s3396_s16  }
 0x643 PF: > { %p3980_p1 = scmp.ge.s32.totalorder %s4730_s27, 2  ;;  %s3422_s13 = sand.u32 1, %s4718_s24  }
 0x644   : > { %s3423_s14 = scalar_lea.sflag [#allocation3], %s3422_s13 }
 0x645   : > { %p3977_p2 = pnand %p3980_p1, %p4818_p6 }
 0x647   : > { %4713 = dma.done.wait (!%p3977_p2), %s3423_s14, 256  }
 0x648   : > { %4715 = vsyncadd (!%p3977_p2), %s3423_s14, 4294967040  ;;  %p17_p3 = scmp.ge.s32.totalorder %s4801_s30, 4   ;;  %s5917_s24 = smov %s4722_s25 }
 0x649   : > { %s5918_s25 = smov %s4726_s26  ;;  %s5919_s26 = smov %s4812_s10 }
 0x64a   : > { %s5920_s27 = smov %s4801_s30  ;;  %19 = sbr.rel (!%p17_p3) target bundleno = 3 (0x3), region = 83 }
 0x651   :  { %3428 = vsyncpa [#allocation3], 1 }
 0x652   :  { %3430 = vsyncpa [#allocation3 + $0x1], 1 }

</bundles_post_ra>
